<compile_context>
chip_gen: v7x
topology: tpu7x:2x2x1
jax: 0.10.0
libtpu: 0.0.40
codegen_flags: <defaults>
</compile_context>

<pallas_src>
import numpy as np
import jax
import jax.numpy as jnp
from jax.experimental import pallas as pl
from jax.experimental.pallas import tpu as pltpu

KERNEL_SIZES = (3, 4, 5)


def _round_up(x, m):
    return ((x + m - 1) // m) * m


def _textcnn_kernel(x_ref, w_ref, bm_ref, fcw_ref, fcb_ref, out_ref):
    """Fused conv(all taps, all branches) + bias/mask + max + ReLU + FC.

    x_ref   : [bt*Lp, k_max*E]  bf16   im2col activation slab (2-D, one matmul)
    w_ref   : [k_max*E, 3F]     bf16   fused conv weight (zero-padded taps)
    bm_ref  : [Lp, 3F]          f32    conv bias + validity mask (-1e9 invalid)
    fcw_ref : [3F, C_pad]       bf16   lane-dense-padded FC weight
    fcb_ref : [1, C_pad]        f32    lane-dense-padded FC bias
    out_ref : [bt, C_pad]       f32
    """
    bt = out_ref.shape[0]
    lp, f3 = bm_ref.shape
    # One big MXU pass: M = bt*Lp, K = k_max*E (160), N = 3F (384), f32 acc.
    y = jnp.dot(x_ref[...], w_ref[...], preferred_element_type=jnp.float32)
    y = y.reshape(bt, lp, f3) + bm_ref[...]          # bias + mask in one add
    pooled = jnp.maximum(jnp.max(y, axis=1), 0.0)    # max-over-time, then ReLU
    # lane-dense final linear (padded to 128 output columns -> unmasked store)
    logits = jnp.dot(pooled.astype(fcw_ref.dtype), fcw_ref[...],
                     preferred_element_type=jnp.float32) + fcb_ref[...]
    out_ref[...] = logits.astype(out_ref.dtype)


def textcnn_forward(emb, conv_ws, conv_bs, fc_w, fc_b, *,
                    kernel_sizes=KERNEL_SIZES, block_b=256):
    """emb: [B, L, E] float32 (already-embedded tokens). Returns [B, C] logits."""
    ks = tuple(kernel_sizes)
    k_min, k_max = min(ks), max(ks)
    B, L, E = emb.shape
    assert L >= k_max, "sequence length must be >= the largest kernel size"
    F = conv_ws[0].shape[-1]
    F3 = len(ks) * F
    C = fc_w.shape[-1]
    C_pad = _round_up(C, 128)
    lout = L - k_min + 1
    Lp = _round_up(lout, 16)          # sublane-aligned time axis (bf16 tile = 16)
    KE = k_max * E

    # batch tile: multiple of 8, no bigger than the (8-rounded) batch
    bt = min(_round_up(block_b, 8), _round_up(B, 8))
    B_pad = _round_up(B, bt)
    n_blocks = B_pad // bt

    # ---- fused conv weight [k_max*E, 3F] (taps zero-padded to k_max), bf16
    cols = []
    for k, w in zip(ks, conv_ws):
        w_pad = jnp.zeros((k_max, E, F), jnp.float32).at[:k].set(
            w.astype(jnp.float32))
        cols.append(w_pad.reshape(KE, F))
    w_fused = jnp.concatenate(cols, axis=-1).astype(jnp.bfloat16)      # [KE, 3F]

    # ---- conv bias + per-branch validity mask fused into one [Lp, 3F] tensor
    #      (valid rows keep the bias; invalid / padded rows become ~-1e9)
    b_fused = jnp.concatenate([b.reshape(1, F) for b in conv_bs],
                              axis=-1).astype(jnp.float32)             # [1, 3F]
    mask_np = np.zeros((Lp, F3), np.float32)
    for bi, k in enumerate(ks):
        mask_np[L - k + 1:, bi * F:(bi + 1) * F] = -1e9
    bias_mask = b_fused + jnp.asarray(mask_np)                         # [Lp, 3F]

    # ---- lane-dense FC params: pad output dim C -> multiple of 128
    fc_w_pad = (jnp.zeros((F3, C_pad), jnp.float32)
                .at[:, :C].set(fc_w.astype(jnp.float32))
                .astype(jnp.bfloat16))
    fc_b_pad = (jnp.zeros((1, C_pad), jnp.float32)
                .at[:, :C].set(fc_b.reshape(1, C).astype(jnp.float32)))

    # ---- im2col slab built once from the (small) padded embedding, directly
    #      at [B_pad*Lp, KE] in bf16.  Padding happens on raw emb, not the slab.
    emb_p = jnp.pad(emb.astype(jnp.bfloat16),
                    ((0, B_pad - B), (0, Lp + k_max - 1 - L), (0, 0)))
    x = jnp.stack([emb_p[:, j:j + Lp, :] for j in range(k_max)], axis=2)
    x = x.reshape(B_pad * Lp, KE)

    out = pl.pallas_call(
        _textcnn_kernel,
        out_shape=jax.ShapeDtypeStruct((B_pad, C_pad), jnp.float32),
        grid=(n_blocks,),
        in_specs=[
            pl.BlockSpec((bt * Lp, KE), lambda i: (i, 0)),   # activation slab
            pl.BlockSpec((KE, F3), lambda i: (0, 0)),        # fused conv W
            pl.BlockSpec((Lp, F3), lambda i: (0, 0)),        # bias + mask
            pl.BlockSpec((F3, C_pad), lambda i: (0, 0)),     # padded fc W
            pl.BlockSpec((1, C_pad), lambda i: (0, 0)),      # padded fc b
        ],
        out_specs=pl.BlockSpec((bt, C_pad), lambda i: (i, 0)),
        compiler_params=pltpu.CompilerParams(
            dimension_semantics=("parallel",)),
    )(x, w_fused, bias_mask, fc_w_pad, fc_b_pad)

    return out[:B, :C]


def init_params(key, vocab_size, embed_dim, num_classes,
                kernel_sizes=KERNEL_SIZES, num_filters=128):
    ks = jax.random.split(key, 2 + 2 * len(kernel_sizes) + 2)
    # embedding table, padding_idx=0 row zeroed (nn.Embedding semantics)
    emb_table = 0.1 * jax.random.normal(ks[0], (vocab_size, embed_dim), jnp.float32)
    emb_table = emb_table.at[0].set(0.0)
    conv_ws, conv_bs = [], []
    for i, k in enumerate(kernel_sizes):
        w = 0.1 * jax.random.normal(ks[1 + 2 * i], (k, embed_dim, num_filters),
                                    jnp.float32)
        b = 0.1 * jax.random.normal(ks[2 + 2 * i], (1, num_filters), jnp.float32)
        conv_ws.append(w)
        conv_bs.append(b)
    fc_w = 0.1 * jax.random.normal(ks[-2],
                                   (len(kernel_sizes) * num_filters, num_classes),
                                   jnp.float32)
    fc_b = 0.1 * jax.random.normal(ks[-1], (1, num_classes), jnp.float32)
    return emb_table, conv_ws, conv_bs, fc_w, fc_b


def reference_forward(emb, conv_ws, conv_bs, fc_w, fc_b, kernel_sizes=KERNEL_SIZES):
    """Pure-JAX reference mirroring the PyTorch forward (eval mode), f32."""
    hp = jax.lax.Precision.HIGHEST
    B, L, E = emb.shape
    pooled = []
    for (k, w, b) in zip(kernel_sizes, conv_ws, conv_bs):
        l_out = L - k + 1
        acc = jnp.zeros((B, l_out, w.shape[-1]), jnp.float32)
        for j in range(k):
            acc = acc + jnp.einsum("ble,ef->blf", emb[:, j:j + l_out, :], w[j],
                                   precision=hp)
        acc = jax.nn.relu(acc + b.reshape(1, 1, -1))
        pooled.append(jnp.max(acc, axis=1))
    cat = jnp.concatenate(pooled, axis=-1)
    return jnp.dot(cat, fc_w, precision=hp) + fc_b.reshape(1, -1)


if __name__ == "__main__":
    # Small shapes consistent with the module.
    VOCAB, EMBED, CLASSES = 50, 32, 8
    NUM_FILTERS = 128
    B, L = 24, 16

    key = jax.random.PRNGKey(0)
    pkey, xkey = jax.random.split(key)
    emb_table, conv_ws, conv_bs, fc_w, fc_b = init_params(
        pkey, VOCAB, EMBED, CLASSES, KERNEL_SIZES, NUM_FILTERS)

    # TODO(synk): nn.Embedding token-id gather stays as plain-JAX indexing glue
    # (data-dependent gather; could be fused via PrefetchScalarGridSpec later).
    x_ids = jax.random.randint(xkey, (B, L), 0, VOCAB, dtype=jnp.int32)
    emb = emb_table[x_ids]                          # [B, L, E]

    # block_b=16 (< default 256) so the tiny demo batch still exercises
    # multiple grid steps plus batch-padding of the final block.
    logits = textcnn_forward(emb, conv_ws, conv_bs, fc_w, fc_b, block_b=16)
    logits = jax.block_until_ready(logits)

    # Reference on bf16-rounded activations/weights (kernel feeds bf16 into the
    # MXU with f32 accumulation); biases stay f32 in both paths.
    rd = lambda a: a.astype(jnp.bfloat16).astype(jnp.float32)
    ref = reference_forward(rd(emb), [rd(w) for w in conv_ws], conv_bs,
                            rd(fc_w), fc_b)

    assert logits.shape == (B, CLASSES)
    max_err = float(jnp.max(jnp.abs(logits - ref)))
    assert jnp.allclose(logits, ref, atol=2e-2, rtol=2e-2), max_err

    print("KERNEL_OK")
</pallas_src>

<mosaic_0001>
module attributes {stable_mosaic.version = 11 : i64} {
  func.func @_textcnn_kernel(%arg0: i32, %arg1: memref<256x160xbf16, #tpu.memory_space<vmem>>, %arg2: memref<160x384xbf16, #tpu.memory_space<vmem>>, %arg3: memref<16x384xf32, #tpu.memory_space<vmem>>, %arg4: memref<384x128xbf16, #tpu.memory_space<vmem>>, %arg5: memref<1x128xf32, #tpu.memory_space<vmem>>, %arg6: memref<16x128xf32, #tpu.memory_space<vmem>>) attributes {dimension_semantics = [#tpu.dimension_semantics<parallel>], iteration_bounds = array<i64: 2>, scalar_prefetch = 0 : i64, scratch_operands = 0 : i64, tpu.core_type = #tpu.core_type<tc>, window_params = [{transform_indices = @transform_0, window_bounds = array<i64: 256, 160>}, {pipeline_mode = #tpu.pipeline_mode<synchronous>, transform_indices = @transform_1, window_bounds = array<i64: 160, 384>}, {pipeline_mode = #tpu.pipeline_mode<synchronous>, transform_indices = @transform_2, window_bounds = array<i64: 16, 384>}, {pipeline_mode = #tpu.pipeline_mode<synchronous>, transform_indices = @transform_3, window_bounds = array<i64: 384, 128>}, {pipeline_mode = #tpu.pipeline_mode<synchronous>, transform_indices = @transform_4, window_bounds = array<i64: 1, 128>}, {transform_indices = @transform_5, window_bounds = array<i64: 16, 128>}]} {
    %c0 = arith.constant 0 : index
    %c0_0 = arith.constant 0 : index
    %0 = vector.load %arg1[%c0, %c0_0] : memref<256x160xbf16, #tpu.memory_space<vmem>>, vector<256x160xbf16>
    %c0_1 = arith.constant 0 : index
    %c0_2 = arith.constant 0 : index
    %1 = vector.load %arg2[%c0_1, %c0_2] : memref<160x384xbf16, #tpu.memory_space<vmem>>, vector<160x384xbf16>
    %cst = arith.constant dense<0.000000e+00> : vector<256x384xf32>
    %2 = tpu.matmul %0, %1, %cst {dimension_numbers = #tpu.dot_dimension_numbers<[1], [0], [0], [1], [0, 0, 1, 1], [], []>} : vector<256x160xbf16>, vector<160x384xbf16>, vector<256x384xf32> -> vector<256x384xf32>
    %3 = vector.shape_cast %2 : vector<256x384xf32> to vector<16x16x384xf32>
    %c0_3 = arith.constant 0 : index
    %c0_4 = arith.constant 0 : index
    %4 = vector.load %arg3[%c0_3, %c0_4] : memref<16x384xf32, #tpu.memory_space<vmem>>, vector<16x384xf32>
    %5 = vector.shape_cast %4 : vector<16x384xf32> to vector<1x16x384xf32>
    %6 = vector.broadcast %5 : vector<1x16x384xf32> to vector<16x16x384xf32>
    %7 = arith.addf %3, %6 : vector<16x16x384xf32>
    %cst_5 = arith.constant dense<0xFF800000> : vector<16x384xf32>
    %8 = vector.multi_reduction <maximumf>, %7, %cst_5 [1] : vector<16x16x384xf32> to vector<16x384xf32>
    %cst_6 = arith.constant 0.000000e+00 : f32
    %9 = vector.broadcast %cst_6 : f32 to vector<16x384xf32>
    %10 = arith.maximumf %8, %9 : vector<16x384xf32>
    %11 = arith.truncf %10 : vector<16x384xf32> to vector<16x384xbf16>
    %c0_7 = arith.constant 0 : index
    %c0_8 = arith.constant 0 : index
    %12 = vector.load %arg4[%c0_7, %c0_8] : memref<384x128xbf16, #tpu.memory_space<vmem>>, vector<384x128xbf16>
    %cst_9 = arith.constant dense<0.000000e+00> : vector<16x128xf32>
    %13 = tpu.matmul %11, %12, %cst_9 {dimension_numbers = #tpu.dot_dimension_numbers<[1], [0], [0], [1], [0, 0, 1, 1], [], []>} : vector<16x384xbf16>, vector<384x128xbf16>, vector<16x128xf32> -> vector<16x128xf32>
    %c0_10 = arith.constant 0 : index
    %c0_11 = arith.constant 0 : index
    %14 = vector.load %arg5[%c0_10, %c0_11] : memref<1x128xf32, #tpu.memory_space<vmem>>, vector<1x128xf32>
    %15 = vector.broadcast %14 : vector<1x128xf32> to vector<16x128xf32>
    %16 = arith.addf %13, %15 : vector<16x128xf32>
    %c0_12 = arith.constant 0 : index
    %c0_13 = arith.constant 0 : index
    %17 = vector.load %arg6[%c0_12, %c0_13] : memref<16x128xf32, #tpu.memory_space<vmem>>, vector<16x128xf32>
    tpu.vector_store %arg6[%c0_12, %c0_13], %16 {strides = array<i32>} : memref<16x128xf32, #tpu.memory_space<vmem>>, vector<16x128xf32>,
    return
  }
  func.func @transform_0(%arg0: i32) -> (i32, i32) {
    %c0_i32 = arith.constant 0 : i32
    %c0_i32_0 = arith.constant 0 : i32
    return %arg0, %c0_i32 : i32, i32
  }
  func.func @transform_1(%arg0: i32) -> (i32, i32) {
    %c0_i32 = arith.constant 0 : i32
    %c0_i32_0 = arith.constant 0 : i32
    %c0_i32_1 = arith.constant 0 : i32
    return %c0_i32, %c0_i32_0 : i32, i32
  }
  func.func @transform_2(%arg0: i32) -> (i32, i32) {
    %c0_i32 = arith.constant 0 : i32
    %c0_i32_0 = arith.constant 0 : i32
    %c0_i32_1 = arith.constant 0 : i32
    return %c0_i32, %c0_i32_0 : i32, i32
  }
  func.func @transform_3(%arg0: i32) -> (i32, i32) {
    %c0_i32 = arith.constant 0 : i32
    %c0_i32_0 = arith.constant 0 : i32
    %c0_i32_1 = arith.constant 0 : i32
    return %c0_i32, %c0_i32_0 : i32, i32
  }
  func.func @transform_4(%arg0: i32) -> (i32, i32) {
    %c0_i32 = arith.constant 0 : i32
    %c0_i32_0 = arith.constant 0 : i32
    %c0_i32_1 = arith.constant 0 : i32
    return %c0_i32, %c0_i32_0 : i32, i32
  }
  func.func @transform_5(%arg0: i32) -> (i32, i32) {
    %c0_i32 = arith.constant 0 : i32
    %c0_i32_0 = arith.constant 0 : i32
    return %arg0, %c0_i32 : i32, i32
  }
}

</mosaic_0001>

<bundles_post_ra>
// kernel: tpu_custom_call.1
= control target key start
LH: loop header
LB: loop body
LE: loop exit
PB: predicated region body
PF: predicated region fallthrough
CT: control target
= control target key end

     0   :  { %10 = vsyncpa [#allocation3], 0  ;;  %s3233_s0 = inlined_call_operand.vmem [shape: bf16[512,160], index: 0, kind: input, shape index: {}]   ;;  %s3234_s1 = inlined_call_operand.vmem [shape: bf16[160,384], index: 1, kind: input, shape index: {}]   ;;  %s3235_s2 = inlined_call_operand.vmem [shape: f32[16,384], index: 2, kind: input, shape index: {}]   ;;  %s3236_s3 = inlined_call_operand.vmem [shape: bf16[384,128], index: 3, kind: input, shape index: {}]   ;;  %s3237_s4 = inlined_call_operand.vmem [shape: f32[1,128], index: 4, kind: input, shape index: {}]   ;;  %s3238_s5 = inlined_call_operand.hbm [shape: f32[32,128], index: 5, kind: output, shape index: {}]  }
   0x1   :  { %12 = vsyncpa [#allocation3 + $0x1], 0  ;;  %s2500_s18 = smov 0   ;;  %s2502_s19 = smov 0  }
   0x2   :  { %s2504_s20 = smov 0   ;;  %s2506_s21 = smov 0  }
   0x3 LB: > { %s2521_s22 = sadd.s32 4294967295, %s2462_s21   ;;  %s2053_s23 = sadd.s32 4294967294, %s2462_s21   ;;  %s2462_s21 = sphi %s2506_s21, %s3249_s21   ;;  %s2458_s20 = sphi %s2504_s20, %s3248_s20   ;;  %s2454_s19 = sphi %s2502_s19, %s3247_s19   ;;  %s2450_s18 = sphi %s2500_s18, %s3246_s18  }
   0x4   : > { %s2525_s24 = sadd.s32 1, %s2462_s21   ;;  %s135_s25 = sadd.s32 1, %s2458_s20 }
   0x5   : > { %s132_s26 = ssub.s32 %s2462_s21, %s2525_s24  ;;  %p145_p0 = scmp.ne.s32.totalorder %s2458_s20, %s2454_s19 }
   0x6   : > { %p133_p1 = scmp.eq.s32.totalorder %s132_s26, 0  ;;  %p146_p2 = scmp.eq.s32.totalorder %s2521_s22, 1 }
   0x7   : > { %p151_p3 = scmp.ne.s32.totalorder %s2454_s19, %s2450_s18  ;;  %p152_p4 = scmp.eq.s32.totalorder %s2053_s23, 1 }
   0x8   : > { %s2536_s27 = scalar_select %p133_p1, %s2458_s20, %s135_s25  }
   0x9   : > { %p2538_p5 = por %p146_p2, %p145_p0  ;;  %p2542_p6 = por %p152_p4, %p151_p3 }
   0xa   : > { %p2056_p7 = scmp.ge.s32.totalorder %s2462_s21, 1  ;;  %p192_p8 = scmp.lt.s32.totalorder %s2462_s21, 3 }
   0xc   : > { %p193_p9 = pnand %p2056_p7, %p192_p8 }
   0xd   : > { %v2282_v0 = vld [vmem:[%s3234_s1 + $0x4] ss:$12 sps:$4 sm:$0xff] (!%p193_p9)   ;;  %v2464_v1 = vmov (!%p193_p9), 0   ;;  %v2284_v2 = vld [vmem:[%s3234_s1 + $0x8] ss:$12 sps:$4 sm:$0xff] (!%p193_p9)   ;;  %s2058_s30 = sshll.u32 (!%p193_p9), %s2521_s22, 5 }
   0xe   : > { %196 = sbr.rel (%p193_p9) target bundleno = 674 (0x2a2), region = 40  ;;  %848 = vmatprep.subr.bf16.mxu1 (!%p193_p9), %v2464_v1  ;;  %655 = vmatprep.subr.bf16.mxu0 (!%p193_p9), %v2282_v0  ;;  %v2285_v3 = vld [vmem:[%s3234_s1] ss:$12 sps:$4 sm:$0xff] (!%p193_p9)   ;;  %v2286_v4 = vld [vmem:[%s3234_s1 + $0x1c] ss:$12 sps:$4 sm:$0xff] (!%p193_p9)   ;;  %p222_p10 = scmp.lt.s32.totalorder (!%p193_p9), %s2058_s30, 63 }
   0xf   : > { %849 = vmatpush1.bf16.msra.mxu1 (!%p193_p9), %v2284_v2  ;;  %656 = vmatpush1.bf16.msra.mxu0 (!%p193_p9), %v2285_v3  ;;  %v2288_v5 = vld [vmem:[%s3234_s1 + $0x20] ss:$12 sps:$4 sm:$0xff] (!%p193_p9)   ;;  %v2289_v6 = vld [vmem:[%s3234_s1 + $0x18] ss:$12 sps:$4 sm:$0xff] (!%p193_p9)   ;;  %v2293_v9 = vld [vmem:[%s3234_s1 + $0x30] ss:$12 sps:$4 sm:$0xff] (!%p193_p9)  }
  0x10   : > { %850 = vmatprep.subr.bf16.mxu1 (!%p193_p9), %v2464_v1  ;;  %657 = vmatprep.subr.bf16.mxu0 (!%p193_p9), %v2286_v4  ;;  %v2290_v7 = vld [vmem:[%s3234_s1 + $0x34] ss:$12 sps:$4 sm:$0xff] (!%p193_p9)   ;;  %v2292_v8 = vld [vmem:[%s3234_s1 + $0x38] ss:$12 sps:$4 sm:$0xff] (!%p193_p9)   ;;  %v2296_v11 = vld [vmem:[%s3234_s1 + $0x50] ss:$12 sps:$4 sm:$0xff] (!%p193_p9)  }
  0x11   : > { %v2294_v10 = vld [vmem:[%s3234_s1 + $0x4c] ss:$12 sps:$4 sm:$0xff] (!%p193_p9)   ;;  %v2297_v12 = vld [vmem:[%s3234_s1 + $0x48] ss:$12 sps:$4 sm:$0xff] (!%p193_p9)   ;;  %v2298_v13 = vld [vmem:[%s3234_s1 + $0x64] ss:$12 sps:$4 sm:$0xff] (!%p193_p9)  }
  0x12   : > { %v2300_v14 = vld [vmem:[%s3234_s1 + $0x68] ss:$12 sps:$4 sm:$0xff] (!%p193_p9)   ;;  %v2301_v15 = vld [vmem:[%s3234_s1 + $0x60] ss:$12 sps:$4 sm:$0xff] (!%p193_p9)   ;;  %v2305_v18 = vld [vmem:[%s3234_s1 + $0x78] ss:$12 sps:$4 sm:$0xff] (!%p193_p9)  }
  0x13   : > { %851 = vmatpush1.bf16.msra.mxu1 (!%p193_p9), %v2288_v5  ;;  %658 = vmatpush1.bf16.msra.mxu0 (!%p193_p9), %v2289_v6  ;;  %v2302_v16 = vld [vmem:[%s3234_s1 + $0x7c] ss:$12 sps:$4 sm:$0xff] (!%p193_p9)   ;;  %v2304_v17 = vld [vmem:[%s3234_s1 + $0x80] ss:$12 sps:$4 sm:$0xff] (!%p193_p9)   ;;  %v2308_v20 = vld [vmem:[%s3234_s1 + $0x98] ss:$12 sps:$4 sm:$0xff] (!%p193_p9)  }
  0x14   : > { %852 = vmatprep.subr.bf16.mxu1 (!%p193_p9), %v2464_v1  ;;  %659 = vmatprep.subr.bf16.mxu0 (!%p193_p9), %v2290_v7  ;;  %v2306_v19 = vld [vmem:[%s3234_s1 + $0x94] ss:$12 sps:$4 sm:$0xff] (!%p193_p9)   ;;  %vm606_vm0 = vcmask (!%p193_p9), 261120   ;;  %v2309_v21 = vld [vmem:[%s3234_s1 + $0x90] ss:$12 sps:$4 sm:$0xff] (!%p193_p9)   ;;  %v2373_v3 = vld [vmem:[%s3236_s3 + $0x48] sm:$0xff] (!%p193_p9)  }
  0x15   : > { %s3251_s30 = smov (!%p222_p10, %s2058_s30), 63  ;;  %v2310_v23 = vld [vmem:[%s3234_s1 + $0xac] ss:$12 sps:$4 sm:$0xff]   ;;  %v2312_v24 = vld [vmem:[%s3234_s1 + $0xb0] ss:$12 sps:$4 sm:$0xff]   ;;  %v2370_v63 = vld [vmem:[%s3236_s3 + $0x40] sm:$0xff]  }
  0x16   : > { %s2185_s7 = sshll.u32 %s3251_s30, 3  ;;  %v2313_v25 = vld [vmem:[%s3234_s1 + $0xa8] ss:$12 sps:$4 sm:$0xff]   ;;  %v2314_v26 = vld [vmem:[%s3234_s1 + $0xc4] ss:$12 sps:$4 sm:$0xff]   ;;  %vm1694_vm1 = vcmask 1041409  }
  0x17   : > { %853 = vmatpush1.bf16.msra.mxu1 %v2292_v8  ;;  %660 = vmatpush1.bf16.msra.mxu0 %v2293_v9  ;;  %s2615_s30 = scalar_lea.vmem %s3233_s0, %s2185_s7  ;;  %v2316_v27 = vld [vmem:[%s3234_s1 + $0xc8] ss:$12 sps:$4 sm:$0xff]   ;;  %v2317_v28 = vld [vmem:[%s3234_s1 + $0xc0] ss:$12 sps:$4 sm:$0xff]   ;;  %v2321_v31 = vld [vmem:[%s3234_s1 + $0xd8] ss:$12 sps:$4 sm:$0xff]  }
  0x18   : > { %854 = vmatprep.subr.bf16.mxu1 %v2464_v1  ;;  %661 = vmatprep.subr.bf16.mxu0 %v2294_v10  ;;  %v2324_v22 = vld [vmem:[%s2615_s30 + $0x4] ss:$8 sps:$4 sm:$0xff]   ;;  %v2318_v29 = vld [vmem:[%s3234_s1 + $0xdc] ss:$12 sps:$4 sm:$0xff]   ;;  %v2327_v34 = vld [vmem:[%s2615_s30 + $0x10] ss:$8 sps:$4 sm:$0xff]  }
  0x19   : > { %2139 = vmatprep.mubr.msk.bf16.mxu1 %vm606_vm0, %v2324_v22  ;;  %2123 = vmatprep.mubr.msk.bf16.mxu0 %vm606_vm0, %v2324_v22  ;;  %v2320_v30 = vld [vmem:[%s3234_s1 + $0xe0] ss:$12 sps:$4 sm:$0xff]   ;;  %v2325_v33 = vld [vmem:[%s2615_s30 + $0x14] ss:$8 sps:$4 sm:$0xff]   ;;  %v2333_v38 = vld [vmem:[%s2615_s30 + $0x30] ss:$8 sps:$4 sm:$0xff]  }
  0x1a   : > { %v2322_v32 = vld [vmem:[%s2615_s30] ss:$8 sps:$4 sm:$0xff]   ;;  %v2328_v35 = vld [vmem:[%s2615_s30 + $0x24] ss:$8 sps:$4 sm:$0xff]   ;;  %v2331_v37 = vld [vmem:[%s2615_s30 + $0x34] ss:$8 sps:$4 sm:$0xff]  }
  0x1b   : > { %855 = vmatpush1.bf16.msra.mxu1 %v2296_v11  ;;  %662 = vmatpush1.bf16.msra.mxu0 %v2297_v12  ;;  %v2330_v36 = vld [vmem:[%s2615_s30 + $0x20] ss:$8 sps:$4 sm:$0xff]   ;;  %v2334_v39 = vld [vmem:[%s2615_s30 + $0x44] ss:$8 sps:$4 sm:$0xff]   ;;  %v2337_v41 = vld [vmem:[%s2615_s30 + $0x54] ss:$8 sps:$4 sm:$0xff]  }
  0x1c   : > { %856 = vmatprep.subr.bf16.mxu1 %v2464_v1  ;;  %663 = vmatprep.subr.bf16.mxu0 %v2298_v13  ;;  %v2336_v40 = vld [vmem:[%s2615_s30 + $0x40] ss:$8 sps:$4 sm:$0xff]   ;;  %v2339_v42 = vld [vmem:[%s2615_s30 + $0x50] ss:$8 sps:$4 sm:$0xff]   ;;  %v2340_v43 = vld [vmem:[%s2615_s30 + $0x64] ss:$8 sps:$4 sm:$0xff]  }
  0x1d   : > { %v2342_v44 = vld [vmem:[%s2615_s30 + $0x60] ss:$8 sps:$4 sm:$0xff]   ;;  %v2343_v45 = vld [vmem:[%s2615_s30 + $0x74] ss:$8 sps:$4 sm:$0xff]   ;;  %v2345_v46 = vld [vmem:[%s2615_s30 + $0x70] ss:$8 sps:$4 sm:$0xff]  }
  0x1e   : > { %v2346_v47 = vld [vmem:[%s2615_s30 + $0x84] ss:$8 sps:$4 sm:$0xff]   ;;  %v2348_v48 = vld [vmem:[%s2615_s30 + $0x80] ss:$8 sps:$4 sm:$0xff]   ;;  %v2349_v49 = vld [vmem:[%s2615_s30 + $0x94] ss:$8 sps:$4 sm:$0xff]  }
  0x1f   : > { %857 = vmatpush1.bf16.msra.mxu1 %v2300_v14  ;;  %664 = vmatpush1.bf16.msra.mxu0 %v2301_v15  ;;  %v2351_v50 = vld [vmem:[%s2615_s30 + $0x90] ss:$8 sps:$4 sm:$0xff]   ;;  %v2352_v51 = vld [vmem:[%s2615_s30 + $0xa4] ss:$8 sps:$4 sm:$0xff]   ;;  %v2354_v52 = vld [vmem:[%s2615_s30 + $0xa0] ss:$8 sps:$4 sm:$0xff]  }
  0x20   : > { %858 = vmatprep.subr.bf16.mxu1 %v2464_v1  ;;  %665 = vmatprep.subr.bf16.mxu0 %v2302_v16  ;;  %v2355_v53 = vld [vmem:[%s2615_s30 + $0xb4] ss:$8 sps:$4 sm:$0xff]   ;;  %v2357_v54 = vld [vmem:[%s2615_s30 + $0xb0] ss:$8 sps:$4 sm:$0xff]   ;;  %v2358_v55 = vld [vmem:[%s2615_s30 + $0xc4] ss:$8 sps:$4 sm:$0xff]  }
  0x21   : > { %v2360_v56 = vld [vmem:[%s2615_s30 + $0xc0] ss:$8 sps:$4 sm:$0xff]   ;;  %v2361_v57 = vld [vmem:[%s2615_s30 + $0xd4] ss:$8 sps:$4 sm:$0xff]   ;;  %v2363_v58 = vld [vmem:[%s2615_s30 + $0xd0] ss:$8 sps:$4 sm:$0xff]  }
  0x22   : > { %v2364_v59 = vld [vmem:[%s2615_s30 + $0xe4] ss:$8 sps:$4 sm:$0xff]   ;;  %v2366_v60 = vld [vmem:[%s2615_s30 + $0xe0] ss:$8 sps:$4 sm:$0xff]   ;;  %v2367_v61 = vld [vmem:[%s2615_s30 + $0xf4] ss:$8 sps:$4 sm:$0xff]  }
  0x23   : > { %859 = vmatpush1.bf16.msra.mxu1 %v2304_v17  ;;  %666 = vmatpush1.bf16.msra.mxu0 %v2305_v18  ;;  %v2369_v62 = vld [vmem:[%s2615_s30 + $0xf0] ss:$8 sps:$4 sm:$0xff]   ;;  %v2371_v0 = vld [vmem:[%s3236_s3] sm:$0xff]   ;;  %v2374_v4 = vld [vmem:[%s3236_s3 + $0x8] sm:$0xff]   ;;  %vm1696_vm2 = vcmask 1042434   ;;  %vm1698_vm3 = vcmask 1043459  }
  0x24   : > { %860 = vmatprep.subr.bf16.mxu1 %v2464_v1  ;;  %667 = vmatprep.subr.bf16.mxu0 %v2306_v19  ;;  %v2372_v2 = vld [vmem:[%s3236_s3 + $0x80] sm:$0xff]   ;;  %v2375_v5 = vld [vmem:[%s3236_s3 + $0x88] sm:$0xff]   ;;  %v2376_v6 = vld [vmem:[%s3236_s3 + $0x50] sm:$0xff]   ;;  %vm1700_vm4 = vcmask 1044484   ;;  %vm1702_vm5 = vcmask 1045509   ;;  %vm1704_vm6 = vcmask 1046534  }
  0x25   : > { %v2377_v7 = vld [vmem:[%s3236_s3 + $0x10] sm:$0xff]   ;;  %v2379_v9 = vld [vmem:[%s3236_s3 + $0x58] sm:$0xff]   ;;  %v2382_v12 = vld [vmem:[%s3236_s3 + $0x60] sm:$0xff]   ;;  %vm1706_vm7 = vcmask 1047559   ;;  %vm2466_vm8 = vmmov 0   ;;  %s218_s15 = sand.u32 1, %s2454_s19  }
  0x26   : > { %v2378_v8 = vld [vmem:[%s3236_s3 + $0x90] sm:$0xff]   ;;  %v2380_v10 = vld [vmem:[%s3236_s3 + $0x18] sm:$0xff]   ;;  %v2383_v13 = vld [vmem:[%s3236_s3 + $0x20] sm:$0xff]   ;;  %s2057_s16 = sshll.u32 %s218_s15, 4  ;;  %s2186_s6 = sshll.u32 %s2521_s22, 8 }
  0x27   : > { %861 = vmatpush1.bf16.msra.mxu1 %v2308_v20  ;;  %668 = vmatpush1.bf16.msra.mxu0 %v2309_v21  ;;  %v2381_v11 = vld [vmem:[%s3236_s3 + $0x98] sm:$0xff]   ;;  %v2768_v14 = vld [vmem:[%s3235_s2 + $0x10] sm:$0xff]  ;;  %v2773_v16 = vld [vmem:[%s3235_s2 + $0x28] sm:$0xff]  ;;  %s220_s25 = scalar_lea.vmem [#allocation2], %s2057_s16  ;;  %s3190_s9 = scalar_lea.hbm %s3238_s5, %s2186_s6 }
  0x28   : > { %862 = vmatprep.subr.bf16.mxu1 %v2464_v1  ;;  %669 = vmatprep.subr.bf16.mxu0 %v2310_v23  ;;  %v2779_v19 = vld [vmem:[%s3235_s2] sm:$0xff]  ;;  %v2784_v21 = vld [vmem:[%s3235_s2 + $0x18] sm:$0xff]  ;;  %v2789_v23 = vld [vmem:[%s3235_s2 + $0x8] sm:$0xff]  ;;  %s1991_s26 = sshll.u32 %s220_s25, 4  ;;  %s3192_s10 = scalar_lea.sflag [#allocation3], %s218_s15  ;;  %s3185_s26 = int_to_ptr.vmem [resolvable:$true] %s1991_s26 }
  0x29   : > { %s2400_s11 = scalar_lea.vmem %s3185_s26, 256  ;;  %s2467_s22 = smov [#allocation2]  }
  0x2a   : > { %p2401_p11 = scmp.ne.s32.totalorder %s3185_s26, %s2400_s11  ;;  %s2404_s12 = sshll.u32 %s2467_s22, 4  ;;  %s2405_s12 = int_to_ptr.vmem [resolvable:$false] %s2404_s12 }
  0x2b   : > { %863 = vmatpush1.bf16.msra.mxu1 %v2312_v24  ;;  %670 = vmatpush1.bf16.msra.mxu0 %v2313_v25  ;;  %v2794_v25 = vld [vmem:[%s3235_s2 + $0x20] sm:$0xff]  ;;  %s2406_s13 = scalar_lea.vmem %s2405_s12, 512  ;;  %p2407_p0 = scmp.lt.s32.totalorder %s3185_s26, %s2405_s12 }
  0x2c   : > { %864 = vmatprep.subr.bf16.mxu1 %v2464_v1  ;;  %671 = vmatprep.subr.bf16.mxu0 %v2314_v26  ;;  %p2402_p12 = pnand %p2401_p11, %p2538_p5  ;;  %p2408_p1 = scmp.lt.s32.totalorder %s2406_s13, %s2400_s11 }
  0x2e   : > { %p2403_p13 = pneg %p2402_p12  ;;  %p2409_p2 = por %p2408_p1, %p2407_p0 }
  0x2f   : > { %865 = vmatpush1.bf16.msra.mxu1 %v2316_v27  ;;  %672 = vmatpush1.bf16.msra.mxu0 %v2317_v28 }
  0x30   : > { %866 = vmatprep.subr.bf16.mxu1 %v2464_v1  ;;  %673 = vmatprep.subr.bf16.mxu0 %v2318_v29  ;;  %v2465_v1 = vmov 0.0   ;;  %v2384_v29 = vld [vmem:[%s3236_s3 + $0xa0] sm:$0xff]   ;;  %p2410_p3 = pnand %p2409_p2, %p2403_p13 }
  0x33   : > { %867 = vmatpush1.bf16.msra.mxu1 %v2320_v30  ;;  %674 = vmatpush1.bf16.msra.mxu0 %v2321_v31 }
  0x34   : > { %2187 = vmatprep.subr.bf16.mxu0 %v2370_v63  ;;  %2218 = vmatprep.subr.bf16.mxu1 %v2465_v1 }
  0x36   : > { %881 = vmatmul.mubr.bf16.vlgmr.msra.gmra.mrb[0].mxu1 %v2322_v32  ;;  %688 = vmatmul.mubr.bf16.vlgmr.msra.gmra.mrb[0].mxu0 %v2322_v32 }
  0x37   : > { %2140 = vmatprep.mubr.msk.bf16.mxu1 %vm606_vm0, %v2325_v33  ;;  %2124 = vmatprep.mubr.msk.bf16.mxu0 %vm606_vm0, %v2325_v33 }
  0x38   : > { %2188 = vmatpush3.bf16.msra.mxu0 %v2371_v0  ;;  %2219 = vmatpush3.bf16.msra.mxu1 %v2372_v2 }
  0x39   : > { %2220 = vmatprep.subr.bf16.mxu1 %v2465_v1  ;;  %2189 = vmatprep.subr.bf16.mxu0 %v2373_v3 }
  0x3c   : > { %2190 = vmatpush3.bf16.msra.mxu0 %v2374_v4  ;;  %2221 = vmatpush3.bf16.msra.mxu1 %v2375_v5 }
  0x3d   : > { %2222 = vmatprep.subr.bf16.mxu1 %v2465_v1  ;;  %2191 = vmatprep.subr.bf16.mxu0 %v2376_v6 }
  0x3e   : > { %889 = vmatmul.mubr.bf16.gmra.mrb[4].mxu1 %v2327_v34  ;;  %698 = vmatmul.mubr.bf16.gmra.mrb[4].mxu0 %v2327_v34 }
  0x3f   : > { %2141 = vmatprep.mubr.msk.bf16.mxu1 %vm606_vm0, %v2328_v35  ;;  %2125 = vmatprep.mubr.msk.bf16.mxu0 %vm606_vm0, %v2328_v35 }
  0x40   : > { %2192 = vmatpush3.bf16.msra.mxu0 %v2377_v7  ;;  %2223 = vmatpush3.bf16.msra.mxu1 %v2378_v8 }
  0x41   : > { %2224 = vmatprep.subr.bf16.mxu1 %v2465_v1  ;;  %2193 = vmatprep.subr.bf16.mxu0 %v2379_v9 }
  0x44   : > { %2194 = vmatpush3.bf16.msra.mxu0 %v2380_v10  ;;  %2225 = vmatpush3.bf16.msra.mxu1 %v2381_v11 }
  0x45   : > { %2226 = vmatprep.subr.bf16.mxu1 %v2465_v1  ;;  %2195 = vmatprep.subr.bf16.mxu0 %v2382_v12 }
  0x46   : > { %897 = vmatmul.mubr.bf16.gmra.mrb[8].mxu1 %v2330_v36  ;;  %708 = vmatmul.mubr.bf16.gmra.mrb[8].mxu0 %v2330_v36 }
  0x47   : > { %2142 = vmatprep.mubr.msk.bf16.mxu1 %vm606_vm0, %v2331_v37  ;;  %2126 = vmatprep.mubr.msk.bf16.mxu0 %vm606_vm0, %v2331_v37 }
  0x48   : > { %2196 = vmatpush3.bf16.msra.mxu0 %v2383_v13  ;;  %2227 = vmatpush3.bf16.msra.mxu1 %v2384_v29 }
  0x49   : > { %2228 = vmatprep.subr.bf16.mxu1 %v2465_v1 }
  0x4e   : > { %905 = vmatmul.mubr.bf16.gmra.mrb[12].mxu1 %v2333_v38  ;;  %718 = vmatmul.mubr.bf16.gmra.mrb[12].mxu0 %v2333_v38 }
  0x4f   : > { %2143 = vmatprep.mubr.msk.bf16.mxu1 %vm606_vm0, %v2334_v39  ;;  %2127 = vmatprep.mubr.msk.bf16.mxu0 %vm606_vm0, %v2334_v39 }
  0x56   : > { %913 = vmatmul.mubr.bf16.gmra.mrb[16].mxu1 %v2336_v40  ;;  %728 = vmatmul.mubr.bf16.gmra.mrb[16].mxu0 %v2336_v40 }
  0x57   : > { %2144 = vmatprep.mubr.msk.bf16.mxu1 %vm606_vm0, %v2337_v41  ;;  %2128 = vmatprep.mubr.msk.bf16.mxu0 %vm606_vm0, %v2337_v41 }
  0x5e   : > { %921 = vmatmul.mubr.bf16.gmra.mrb[20].mxu1 %v2339_v42  ;;  %738 = vmatmul.mubr.bf16.gmra.mrb[20].mxu0 %v2339_v42 }
  0x5f   : > { %2145 = vmatprep.mubr.msk.bf16.mxu1 %vm606_vm0, %v2340_v43  ;;  %2129 = vmatprep.mubr.msk.bf16.mxu0 %vm606_vm0, %v2340_v43 }
  0x66   : > { %929 = vmatmul.mubr.bf16.gmra.mrb[24].mxu1 %v2342_v44  ;;  %748 = vmatmul.mubr.bf16.gmra.mrb[24].mxu0 %v2342_v44 }
  0x67   : > { %2146 = vmatprep.mubr.msk.bf16.mxu1 %vm606_vm0, %v2343_v45  ;;  %2130 = vmatprep.mubr.msk.bf16.mxu0 %vm606_vm0, %v2343_v45 }
  0x6e   : > { %937 = vmatmul.mubr.bf16.gmra.mrb[28].mxu1 %v2345_v46  ;;  %758 = vmatmul.mubr.bf16.gmra.mrb[28].mxu0 %v2345_v46 }
  0x6f   : > { %2147 = vmatprep.mubr.msk.bf16.mxu1 %vm606_vm0, %v2346_v47  ;;  %2131 = vmatprep.mubr.msk.bf16.mxu0 %vm606_vm0, %v2346_v47 }
  0x76   : > { %945 = vmatmul.mubr.bf16.gmra.mrb[32].mxu1 %v2348_v48  ;;  %768 = vmatmul.mubr.bf16.gmra.mrb[32].mxu0 %v2348_v48 }
  0x77   : > { %2148 = vmatprep.mubr.msk.bf16.mxu1 %vm606_vm0, %v2349_v49  ;;  %2132 = vmatprep.mubr.msk.bf16.mxu0 %vm606_vm0, %v2349_v49  ;;  %v2385_v49 = vld [vmem:[%s3236_s3 + $0x68] sm:$0xff]  }
  0x78   : > { %2197 = vmatprep.subr.bf16.mxu0 %v2385_v49 }
  0x7e   : > { %953 = vmatmul.mubr.bf16.gmra.mrb[36].mxu1 %v2351_v50  ;;  %778 = vmatmul.mubr.bf16.gmra.mrb[36].mxu0 %v2351_v50  ;;  %v2386_v50 = vld [vmem:[%s3236_s3 + $0x28] sm:$0xff]  }
  0x7f   : > { %2149 = vmatprep.mubr.msk.bf16.mxu1 %vm606_vm0, %v2352_v51  ;;  %2133 = vmatprep.mubr.msk.bf16.mxu0 %vm606_vm0, %v2352_v51 }
  0x80   : > { %2198 = vmatpush3.bf16.msra.mxu0 %v2386_v50 }
  0x86   : > { %961 = vmatmul.mubr.bf16.gmra.mrb[40].mxu1 %v2354_v52  ;;  %788 = vmatmul.mubr.bf16.gmra.mrb[40].mxu0 %v2354_v52 }
  0x87   : > { %2150 = vmatprep.mubr.msk.bf16.mxu1 %vm606_vm0, %v2355_v53  ;;  %2134 = vmatprep.mubr.msk.bf16.mxu0 %vm606_vm0, %v2355_v53 }
  0x8e   : > { %969 = vmatmul.mubr.bf16.gmra.mrb[44].mxu1 %v2357_v54  ;;  %798 = vmatmul.mubr.bf16.gmra.mrb[44].mxu0 %v2357_v54 }
  0x8f   : > { %2151 = vmatprep.mubr.msk.bf16.mxu1 %vm606_vm0, %v2358_v55  ;;  %2135 = vmatprep.mubr.msk.bf16.mxu0 %vm606_vm0, %v2358_v55 }
  0x96   : > { %977 = vmatmul.mubr.bf16.gmra.mrb[48].mxu1 %v2360_v56  ;;  %808 = vmatmul.mubr.bf16.gmra.mrb[48].mxu0 %v2360_v56 }
  0x97   : > { %2152 = vmatprep.mubr.msk.bf16.mxu1 %vm606_vm0, %v2361_v57  ;;  %2136 = vmatprep.mubr.msk.bf16.mxu0 %vm606_vm0, %v2361_v57 }
  0x9e   : > { %985 = vmatmul.mubr.bf16.gmra.mrb[52].mxu1 %v2363_v58  ;;  %818 = vmatmul.mubr.bf16.gmra.mrb[52].mxu0 %v2363_v58 }
  0x9f   : > { %2153 = vmatprep.mubr.msk.bf16.mxu1 %vm606_vm0, %v2364_v59  ;;  %2137 = vmatprep.mubr.msk.bf16.mxu0 %vm606_vm0, %v2364_v59 }
  0xa6   : > { %993 = vmatmul.mubr.bf16.gmra.mrb[56].mxu1 %v2366_v60  ;;  %828 = vmatmul.mubr.bf16.gmra.mrb[56].mxu0 %v2366_v60 }
  0xa7   : > { %2154 = vmatprep.mubr.msk.bf16.mxu1 %vm606_vm0, %v2367_v61  ;;  %2138 = vmatprep.mubr.msk.bf16.mxu0 %vm606_vm0, %v2367_v61 }
  0xae   : > { %1001 = vmatmul.mubr.bf16.gmra.mrb[60].mxu1 %v2369_v62  ;;  %838 = vmatmul.mubr.bf16.gmra.mrb[60].mxu0 %v2369_v62 }
  0xaf   : > { %2234 = vmatprep.mubr.msk.bf16.mxu1 %vm2466_vm8, %v2465_v1 }
 0x109   : > { %v882_v15 = vpop.f32.mrb[0].mxu1  ;;  %v689_v18 = vpop.f32.mrb[0].mxu0 }
 0x10a   : > { %v1017_v17 = vadd.f32 %v2768_v14, %v882_v15  ;;  %v884_v20 = vpop.f32.mrb[1].mxu1  ;;  %v691_v22 = vpop.f32.mrb[1].mxu0  ;;  %v1015_v30 = vadd.f32 %v2779_v19, %v689_v18 }
 0x10b   : > { %v885_v24 = vpop.f32.mrb[2].mxu1  ;;  %v693_v27 = vpop.f32.mrb[2].mxu0  ;;  %v1016_v33 = vadd.f32 %v2789_v23, %v691_v22 }
 0x10c   : > { %v1020_v26 = vadd.f32 %v2773_v16, %v885_v24  ;;  %v887_v28 = vpop.f32.mrb[3].mxu1  ;;  %v1018_v31 = vadd.f32 %v2784_v21, %v693_v27  ;;  %v695_v32 = vpop.f32.mrb[3].mxu0 }
 0x10d   : > { %v1019_v35 = vadd.f32 %v2794_v25, %v695_v32 }
 0x10e   : > { %v1125_v34 = vmax.f32 %v1017_v17, %v1020_v26  ;;  %v1111_v36 = vmax.f32 %v1015_v30, %v1018_v31 }
 0x10f   : > { %v1118_v38 = vmax.f32 %v1016_v33, %v1019_v35 }
 0x110   : > { %v1126_v37 = vrot.slane %v1125_v34, 4  ;;  %v1112_v39 = vrot.slane %v1111_v36, 4 }
 0x111   : > { %v890_v40 = vpop.f32.mrb[4].mxu1  ;;  %v1119_v42 = vrot.slane %v1118_v38, 4  ;;  %v699_v44 = vpop.f32.mrb[4].mxu0 }
 0x112   : > { %v1127_v41 = vmax.f32 %v1125_v34, %v1126_v37  ;;  %v1023_v43 = vadd.f32 %v2768_v14, %v890_v40  ;;  %v892_v45 = vpop.f32.mrb[5].mxu1  ;;  %v1113_v46 = vmax.f32 %v1111_v36, %v1112_v39  ;;  %v701_v47 = vpop.f32.mrb[5].mxu0  ;;  %v1021_v57 = vadd.f32 %v2779_v19, %v699_v44  ;;  %v2387_v44 = vld [vmem:[%s3236_s3 + $0xa8] sm:$0xff]  }
 0x113   : > { %v893_v48 = vpop.f32.mrb[6].mxu1  ;;  %v1120_v52 = vmax.f32 %v1118_v38, %v1119_v42  ;;  %v703_v54 = vpop.f32.mrb[6].mxu0  ;;  %v1022_v58 = vadd.f32 %v2789_v23, %v701_v47  ;;  %2229 = vmatpush3.bf16.msra.mxu1 %v2387_v44 }
 0x114   : > { %v1128_v51 = vrot.slane %v1127_v41, 2  ;;  %v1026_v53 = vadd.f32 %v2773_v16, %v893_v48  ;;  %v895_v55 = vpop.f32.mrb[7].mxu1  ;;  %v1114_v56 = vrot.slane %v1113_v46, 2  ;;  %v1024_v59 = vadd.f32 %v2784_v21, %v703_v54  ;;  %v705_v60 = vpop.f32.mrb[7].mxu0  ;;  %2230 = vmatprep.subr.bf16.mxu1 %v2465_v1 }
 0x115   : > { %v1121_v62 = vrot.slane %v1120_v52, 2  ;;  %v1025_v0 = vadd.f32 %v2794_v25, %v705_v60 }
 0x116   : > { %v1129_v61 = vmax.f32 %v1127_v41, %v1128_v51  ;;  %v1146_v63 = vmax.f32 %v1023_v43, %v1026_v53  ;;  %v1115_v2 = vmax.f32 %v1113_v46, %v1114_v56  ;;  %v1132_v3 = vmax.f32 %v1021_v57, %v1024_v59 }
 0x117   : > { %v1122_v5 = vmax.f32 %v1120_v52, %v1121_v62  ;;  %v1139_v7 = vmax.f32 %v1022_v58, %v1025_v0 }
 0x118   : > { %v1130_v4 = vrot.slane %v1129_v61, 1  ;;  %v1147_v6 = vrot.slane %v1146_v63, 4  ;;  %v1116_v8 = vrot.slane %v1115_v2, 1  ;;  %v1133_v9 = vrot.slane %v1132_v3, 4 }
 0x119   : > { %v898_v10 = vpop.f32.mrb[8].mxu1  ;;  %v1123_v12 = vrot.slane %v1122_v5, 1  ;;  %v1140_v15 = vrot.slane %v1139_v7, 4  ;;  %v709_v17 = vpop.f32.mrb[8].mxu0 }
 0x11a   : > { %v1131_v11 = vmax.f32 %v1129_v61, %v1130_v4  ;;  %v1148_v13 = vmax.f32 %v1146_v63, %v1147_v6  ;;  %v900_v18 = vpop.f32.mrb[9].mxu1  ;;  %v1117_v20 = vmax.f32 %v1115_v2, %v1116_v8  ;;  %v1134_v22 = vmax.f32 %v1132_v3, %v1133_v9  ;;  %v711_v27 = vpop.f32.mrb[9].mxu0 }
 0x11b   : > { %v1029_v24 = vadd.f32 %v2768_v14, %v898_v10  ;;  %v1027_v26 = vadd.f32 %v2779_v19, %v709_v17  ;;  %v901_v28 = vpop.f32.mrb[10].mxu1  ;;  %v1124_v30 = vmax.f32 %v1122_v5, %v1123_v12  ;;  %v1141_v32 = vmax.f32 %v1139_v7, %v1140_v15  ;;  %v713_v33 = vpop.f32.mrb[10].mxu0 }
 0x11c   : > { %v1449_v29 = vmax.f32 %v1131_v11, 0.0  ;;  %v1149_v31 = vrot.slane %v1148_v13, 2  ;;  %v903_v34 = vpop.f32.mrb[11].mxu1  ;;  %v1447_v35 = vmax.f32 %v1117_v20, 0.0  ;;  %v1135_v36 = vrot.slane %v1134_v22, 2  ;;  %v715_v39 = vpop.f32.mrb[11].mxu0 }
 0x11d   : > { %v1028_v37 = vadd.f32 %v2789_v23, %v711_v27  ;;  %v1032_v38 = vadd.f32 %v2773_v16, %v901_v28  ;;  %v1448_v41 = vmax.f32 %v1124_v30, 0.0  ;;  %v1142_v43 = vrot.slane %v1141_v32, 2 }
 0x11e   : > { %v2821_v40 = vpack.c.bf16 %v1449_v29, %v1449_v29  ;;  %v1150_v42 = vmax.f32 %v1148_v13, %v1149_v31  ;;  %v2826_v45 = vpack.c.bf16 %v1447_v35, %v1447_v35  ;;  %v1136_v46 = vmax.f32 %v1134_v22, %v1135_v36  ;;  %v2388_v36 = vld [vmem:[%s3236_s3 + $0x70] sm:$0xff]  }
 0x11f   : > { %v1167_v47 = vmax.f32 %v1029_v24, %v1032_v38  ;;  %v1030_v48 = vadd.f32 %v2784_v21, %v713_v33  ;;  %v2830_v50 = vpack.c.bf16 %v1448_v41, %v1448_v41  ;;  %v1143_v52 = vmax.f32 %v1141_v32, %v1142_v43  ;;  %2199 = vmatprep.subr.bf16.mxu0 %v2388_v36 }
 0x120   : > { %v1648_v49 = vunpack.c.l.b16 %v2821_v40  ;;  %v1151_v51 = vrot.slane %v1150_v42, 1  ;;  %v1646_v53 = vunpack.c.l.b16 %v2826_v45  ;;  %v1137_v54 = vrot.slane %v1136_v46, 1 }
 0x121   : > { %v1168_v55 = vrot.slane %v1167_v47, 4  ;;  %v1153_v56 = vmax.f32 %v1027_v26, %v1030_v48  ;;  %v906_v57 = vpop.f32.mrb[12].mxu1  ;;  %v1647_v58 = vunpack.c.l.b16 %v2830_v50  ;;  %v1144_v60 = vrot.slane %v1143_v52, 1  ;;  %v719_v62 = vpop.f32.mrb[12].mxu0 }
 0x122   : > { %v1152_v59 = vmax.f32 %v1150_v42, %v1151_v51  ;;  %v1031_v61 = vadd.f32 %v2794_v25, %v715_v39  ;;  %v908_v63 = vpop.f32.mrb[13].mxu1  ;;  %v1138_v0 = vmax.f32 %v1136_v46, %v1137_v54  ;;  %v1035_v4 = vadd.f32 %v2768_v14, %v906_v57  ;;  %v721_v5 = vpop.f32.mrb[13].mxu0  ;;  %v2390_v57 = vld [vmem:[%s3236_s3 + $0xb0] sm:$0xff]  }
 0x123   : > { %v1169_v2 = vmax.f32 %v1167_v47, %v1168_v55  ;;  %v1154_v3 = vrot.slane %v1153_v56, 4  ;;  %v909_v6 = vpop.f32.mrb[14].mxu1  ;;  %v1145_v8 = vmax.f32 %v1143_v52, %v1144_v60  ;;  %v1033_v10 = vadd.f32 %v2779_v19, %v719_v62  ;;  %v723_v11 = vpop.f32.mrb[14].mxu0  ;;  %2231 = vmatpush3.bf16.msra.mxu1 %v2390_v57 }
 0x124   : > { %v1452_v7 = vmax.f32 %v1152_v59, 0.0  ;;  %v1160_v9 = vmax.f32 %v1028_v37, %v1031_v61  ;;  %v911_v12 = vpop.f32.mrb[15].mxu1  ;;  %v1450_v13 = vmax.f32 %v1138_v0, 0.0  ;;  %v1034_v18 = vadd.f32 %v2789_v23, %v721_v5  ;;  %v725_v20 = vpop.f32.mrb[15].mxu0  ;;  %v2389_v37 = vld [vmem:[%s3236_s3 + $0x30] sm:$0xff]   ;;  %2232 = vmatprep.subr.bf16.mxu1 %v2465_v1 }
 0x125   : > { %v1170_v15 = vrot.slane %v1169_v2, 2  ;;  %v1155_v17 = vmax.f32 %v1153_v56, %v1154_v3  ;;  %v1451_v24 = vmax.f32 %v1145_v8, 0.0  ;;  %v1038_v27 = vadd.f32 %v2773_v16, %v909_v6  ;;  %2200 = vmatpush3.bf16.msra.mxu0 %v2389_v37  ;;  %v2391_v12 = vld [vmem:[%s3236_s3 + $0x78] sm:$0xff]  }
 0x126   : > { %v1500_v22 = vpack.c.bf16 %v1452_v7, %v1452_v7  ;;  %v1161_v26 = vrot.slane %v1160_v9, 4  ;;  %v1498_v28 = vpack.c.bf16 %v1450_v13, %v1450_v13  ;;  %v1036_v31 = vadd.f32 %v2784_v21, %v723_v11  ;;  %v2392_v13 = vld [vmem:[%s3236_s3 + $0x38] sm:$0xff]   ;;  %2201 = vmatprep.subr.bf16.mxu0 %v2391_v12 }
 0x127   : > { %v1171_v29 = vmax.f32 %v1169_v2, %v1170_v15  ;;  %v1156_v30 = vrot.slane %v1155_v17, 2  ;;  %v1499_v33 = vpack.c.bf16 %v1451_v24, %v1451_v24  ;;  %v1188_v35 = vmax.f32 %v1035_v4, %v1038_v27  ;;  %v2393_v15 = vld [vmem:[%s3236_s3 + $0xb8] sm:$0xff]  }
 0x128   : > { %v1651_v32 = vunpack.c.l.b16 %v1500_v22  ;;  %v1162_v34 = vmax.f32 %v1160_v9, %v1161_v26  ;;  %v1649_v38 = vunpack.c.l.b16 %v1498_v28  ;;  %v1174_v41 = vmax.f32 %v1033_v10, %v1036_v31  ;;  %2233 = vmatpush3.bf16.msra.mxu1 %v2393_v15 }
 0x129   : > { %v1172_v39 = vrot.slane %v1171_v29, 1  ;;  %v1157_v40 = vmax.f32 %v1155_v17, %v1156_v30  ;;  %v914_v42 = vpop.f32.mrb[16].mxu1  ;;  %v1650_v44 = vunpack.c.l.b16 %v1499_v33  ;;  %v1189_v46 = vrot.slane %v1188_v35, 4  ;;  %v729_v47 = vpop.f32.mrb[16].mxu0  ;;  %2202 = vmatpush3.bf16.msra.mxu0 %v2392_v13 }
 0x12a   : > { %v1715_v43 = vsel %vm1694_vm1, %v1651_v32, %v1648_v49  ;;  %v1163_v45 = vrot.slane %v1162_v34, 2  ;;  %v916_v48 = vpop.f32.mrb[17].mxu1  ;;  %v2849_v50 = vsel %vm1694_vm1, %v1649_v38, %v1646_v53  ;;  %v1175_v54 = vrot.slane %v1174_v41, 4  ;;  %v731_v55 = vpop.f32.mrb[17].mxu0 }
 0x12b   : > { %v1173_v51 = vmax.f32 %v1171_v29, %v1172_v39  ;;  %v1158_v52 = vrot.slane %v1157_v40, 1  ;;  %v917_v56 = vpop.f32.mrb[18].mxu1  ;;  %v2855_v49 = vsel %vm1694_vm1, %v1650_v44, %v1647_v58  ;;  %v1190_v60 = vmax.f32 %v1188_v35, %v1189_v46  ;;  %v733_v62 = vpop.f32.mrb[18].mxu0 }
 0x12c   : > { %v1164_v59 = vmax.f32 %v1162_v34, %v1163_v45  ;;  %v1037_v61 = vadd.f32 %v2794_v25, %v725_v20  ;;  %v919_v53 = vpop.f32.mrb[19].mxu1  ;;  %v1176_v2 = vmax.f32 %v1174_v41, %v1175_v54  ;;  %v1041_v3 = vadd.f32 %v2768_v14, %v914_v42  ;;  %v735_v4 = vpop.f32.mrb[19].mxu0 }
 0x12d   : > { %v1455_v63 = vmax.f32 %v1173_v51, 0.0  ;;  %v1159_v0 = vmax.f32 %v1157_v40, %v1158_v52  ;;  %v1191_v6 = vrot.slane %v1190_v60, 2  ;;  %v1039_v8 = vadd.f32 %v2779_v19, %v729_v47 }
 0x12e   : > { %v1165_v5 = vrot.slane %v1164_v59, 1  ;;  %v1181_v7 = vmax.f32 %v1034_v18, %v1037_v61  ;;  %v1177_v10 = vrot.slane %v1176_v2, 2  ;;  %v1040_v11 = vadd.f32 %v2789_v23, %v731_v55 }
 0x12f   : > { %v1503_v58 = vpack.c.bf16 %v1455_v63, %v1455_v63  ;;  %v1453_v9 = vmax.f32 %v1159_v0, 0.0  ;;  %v1192_v18 = vmax.f32 %v1190_v60, %v1191_v6  ;;  %v1044_v22 = vadd.f32 %v2773_v16, %v917_v56 }
 0x130   : > { %v1166_v17 = vmax.f32 %v1164_v59, %v1165_v5  ;;  %v1182_v20 = vrot.slane %v1181_v7, 4  ;;  %v1178_v27 = vmax.f32 %v1176_v2, %v1177_v10  ;;  %v1042_v28 = vadd.f32 %v2784_v21, %v733_v62 }
 0x131   : > { %v1654_v24 = vunpack.c.l.b16 %v1503_v58  ;;  %v1501_v26 = vpack.c.bf16 %v1453_v9, %v1453_v9  ;;  %v922_v29 = vpop.f32.mrb[20].mxu1  ;;  %v1193_v31 = vrot.slane %v1192_v18, 1  ;;  %v1209_v33 = vmax.f32 %v1041_v3, %v1044_v22  ;;  %v739_v34 = vpop.f32.mrb[20].mxu0 }
 0x132   : > { %v1454_v30 = vmax.f32 %v1166_v17, 0.0  ;;  %v1183_v32 = vmax.f32 %v1181_v7, %v1182_v20  ;;  %v924_v35 = vpop.f32.mrb[21].mxu1  ;;  %v1179_v38 = vrot.slane %v1178_v27, 1  ;;  %v1195_v39 = vmax.f32 %v1039_v8, %v1042_v28  ;;  %v741_v40 = vpop.f32.mrb[21].mxu0 }
 0x133   : > { %v1716_v36 = vsel %vm1696_vm2, %v1654_v24, %v1715_v43  ;;  %v1652_v37 = vunpack.c.l.b16 %v1501_v26  ;;  %v925_v41 = vpop.f32.mrb[22].mxu1  ;;  %v1194_v44 = vmax.f32 %v1192_v18, %v1193_v31  ;;  %v1210_v46 = vrot.slane %v1209_v33, 4  ;;  %v743_v47 = vpop.f32.mrb[22].mxu0 }
 0x134   : > { %v1502_v42 = vpack.c.bf16 %v1454_v30, %v1454_v30  ;;  %v1184_v45 = vrot.slane %v1183_v32, 2  ;;  %v927_v48 = vpop.f32.mrb[23].mxu1  ;;  %v1180_v52 = vmax.f32 %v1178_v27, %v1179_v38  ;;  %v1196_v54 = vrot.slane %v1195_v39, 4  ;;  %v745_v56 = vpop.f32.mrb[23].mxu0 }
 0x135   : > { %v1697_v51 = vsel %vm1696_vm2, %v1652_v37, %v2849_v50  ;;  %v1043_v55 = vadd.f32 %v2794_v25, %v735_v4  ;;  %v1458_v57 = vmax.f32 %v1194_v44, 0.0  ;;  %v1211_v60 = vmax.f32 %v1209_v33, %v1210_v46 }
 0x136   : > { %v1653_v43 = vunpack.c.l.b16 %v1502_v42  ;;  %v1185_v59 = vmax.f32 %v1183_v32, %v1184_v45  ;;  %v1456_v61 = vmax.f32 %v1180_v52, 0.0  ;;  %v1197_v62 = vmax.f32 %v1195_v39, %v1196_v54 }
 0x137   : > { %v1202_v53 = vmax.f32 %v1040_v11, %v1043_v55  ;;  %v1047_v63 = vadd.f32 %v2768_v14, %v922_v29  ;;  %v1506_v2 = vpack.c.bf16 %v1458_v57, %v1458_v57  ;;  %v1212_v3 = vrot.slane %v1211_v60, 2 }
 0x138   : > { %v2880_v0 = vsel %vm1696_vm2, %v1653_v43, %v2855_v49  ;;  %v1186_v50 = vrot.slane %v1185_v59, 1  ;;  %v1504_v5 = vpack.c.bf16 %v1456_v61, %v1456_v61  ;;  %v1198_v6 = vrot.slane %v1197_v62, 2 }
 0x139   : > { %v1203_v4 = vrot.slane %v1202_v53, 4  ;;  %v1045_v7 = vadd.f32 %v2779_v19, %v739_v34  ;;  %v930_v8 = vpop.f32.mrb[24].mxu1  ;;  %v1657_v58 = vunpack.c.l.b16 %v1506_v2  ;;  %v1213_v10 = vmax.f32 %v1211_v60, %v1212_v3  ;;  %v749_v12 = vpop.f32.mrb[24].mxu0 }
 0x13a   : > { %v1187_v9 = vmax.f32 %v1185_v59, %v1186_v50  ;;  %v1046_v11 = vadd.f32 %v2789_v23, %v741_v40  ;;  %v932_v13 = vpop.f32.mrb[25].mxu1  ;;  %v1655_v15 = vunpack.c.l.b16 %v1504_v5  ;;  %v1199_v49 = vmax.f32 %v1197_v62, %v1198_v6  ;;  %v751_v20 = vpop.f32.mrb[25].mxu0 }
 0x13b   : > { %v1204_v17 = vmax.f32 %v1202_v53, %v1203_v4  ;;  %v1050_v18 = vadd.f32 %v2773_v16, %v925_v41  ;;  %v933_v22 = vpop.f32.mrb[26].mxu1  ;;  %v1717_v24 = vsel %vm1698_vm3, %v1657_v58, %v1716_v36  ;;  %v1214_v27 = vrot.slane %v1213_v10, 1  ;;  %v753_v29 = vpop.f32.mrb[26].mxu0 }
 0x13c   : > { %v1457_v26 = vmax.f32 %v1187_v9, 0.0  ;;  %v1048_v28 = vadd.f32 %v2784_v21, %v743_v47  ;;  %v935_v30 = vpop.f32.mrb[27].mxu1  ;;  %v1699_v31 = vsel %vm1698_vm3, %v1655_v15, %v1697_v51  ;;  %v1200_v32 = vrot.slane %v1199_v49, 1  ;;  %v755_v35 = vpop.f32.mrb[27].mxu0 }
 0x13d   : > { %v1205_v33 = vrot.slane %v1204_v17, 2  ;;  %v1230_v34 = vmax.f32 %v1047_v63, %v1050_v18  ;;  %v1215_v38 = vmax.f32 %v1213_v10, %v1214_v27  ;;  %v1049_v40 = vadd.f32 %v2794_v25, %v745_v56 }
 0x13e   : > { %v2888_v37 = vpack.c.bf16 %v1457_v26, %v1457_v26  ;;  %v1216_v39 = vmax.f32 %v1045_v7, %v1048_v28  ;;  %v1201_v41 = vmax.f32 %v1199_v49, %v1200_v32  ;;  %v1053_v44 = vadd.f32 %v2768_v14, %v930_v8 }
 0x13f   : > { %v1206_v36 = vmax.f32 %v1204_v17, %v1205_v33  ;;  %v1231_v42 = vrot.slane %v1230_v34, 4  ;;  %v1461_v46 = vmax.f32 %v1215_v38, 0.0  ;;  %v1223_v48 = vmax.f32 %v1046_v11, %v1049_v40 }
 0x140   : > { %v1217_v47 = vrot.slane %v1216_v39, 4  ;;  %v1459_v51 = vmax.f32 %v1201_v41, 0.0  ;;  %v1051_v55 = vadd.f32 %v2779_v19, %v749_v12  ;;  %v1052_v56 = vadd.f32 %v2789_v23, %v751_v20 }
 0x141   : > { %v1207_v52 = vrot.slane %v1206_v36, 1  ;;  %v1232_v54 = vmax.f32 %v1230_v34, %v1231_v42  ;;  %v938_v43 = vpop.f32.mrb[28].mxu1  ;;  %v1509_v57 = vpack.c.bf16 %v1461_v46, %v1461_v46  ;;  %v1224_v60 = vrot.slane %v1223_v48, 4  ;;  %v759_v61 = vpop.f32.mrb[28].mxu0 }
 0x142   : > { %v1218_v59 = vmax.f32 %v1216_v39, %v1217_v47  ;;  %v940_v62 = vpop.f32.mrb[29].mxu1  ;;  %v1507_v53 = vpack.c.bf16 %v1459_v51, %v1459_v51  ;;  %v1056_v50 = vadd.f32 %v2773_v16, %v933_v22  ;;  %v761_v3 = vpop.f32.mrb[29].mxu0  ;;  %v1054_v8 = vadd.f32 %v2784_v21, %v753_v29 }
 0x143   : > { %v1208_v63 = vmax.f32 %v1206_v36, %v1207_v52  ;;  %v1233_v2 = vrot.slane %v1232_v54, 2  ;;  %v941_v5 = vpop.f32.mrb[30].mxu1  ;;  %v1660_v6 = vunpack.c.l.b16 %v1509_v57  ;;  %v1225_v7 = vmax.f32 %v1223_v48, %v1224_v60  ;;  %v763_v58 = vpop.f32.mrb[30].mxu0 }
 0x144   : > { %v1219_v4 = vrot.slane %v1218_v59, 2  ;;  %v943_v9 = vpop.f32.mrb[31].mxu1  ;;  %v1658_v10 = vunpack.c.l.b16 %v1507_v53  ;;  %v1251_v13 = vmax.f32 %v1053_v44, %v1056_v50  ;;  %v2897_v15 = vpop.f32.mrb[31].mxu0  ;;  %v1237_v20 = vmax.f32 %v1051_v55, %v1054_v8 }
 0x145   : > { %v1460_v11 = vmax.f32 %v1208_v63, 0.0  ;;  %v1234_v12 = vmax.f32 %v1232_v54, %v1233_v2  ;;  %v1718_v49 = vsel %vm1700_vm4, %v1660_v6, %v1717_v24  ;;  %v1226_v18 = vrot.slane %v1225_v7, 2 }
 0x146   : > { %v1220_v17 = vmax.f32 %v1218_v59, %v1219_v4  ;;  %v1701_v22 = vsel %vm1700_vm4, %v1658_v10, %v1699_v31  ;;  %v1252_v28 = vrot.slane %v1251_v13, 4  ;;  %v1238_v32 = vrot.slane %v1237_v20, 4 }
 0x147   : > { %v2901_v26 = vpack.c.bf16 %v1460_v11, %v1460_v11  ;;  %v1235_v27 = vrot.slane %v1234_v12, 1  ;;  %v1227_v30 = vmax.f32 %v1225_v7, %v1226_v18  ;;  %v1055_v33 = vadd.f32 %v2794_v25, %v755_v35 }
 0x148   : > { %v1221_v29 = vrot.slane %v1220_v17, 1  ;;  %v1253_v39 = vmax.f32 %v1251_v13, %v1252_v28  ;;  %v1059_v24 = vadd.f32 %v2768_v14, %v938_v43  ;;  %v1239_v42 = vmax.f32 %v1237_v20, %v1238_v32 }
 0x149   : > { %v1236_v38 = vmax.f32 %v1234_v12, %v1235_v27  ;;  %v946_v40 = vpop.f32.mrb[32].mxu1  ;;  %v1228_v36 = vrot.slane %v1227_v30, 1  ;;  %v1244_v31 = vmax.f32 %v1052_v56, %v1055_v33  ;;  %v769_v44 = vpop.f32.mrb[32].mxu0  ;;  %v1057_v51 = vadd.f32 %v2779_v19, %v759_v61 }
 0x14a   : > { %v1222_v41 = vmax.f32 %v1220_v17, %v1221_v29  ;;  %v948_v46 = vpop.f32.mrb[33].mxu1  ;;  %v1254_v48 = vrot.slane %v1253_v39, 2  ;;  %v1058_v52 = vadd.f32 %v2789_v23, %v761_v3  ;;  %v771_v35 = vpop.f32.mrb[33].mxu0  ;;  %v1240_v59 = vrot.slane %v1239_v42, 2 }
 0x14b   : > { %v1464_v47 = vmax.f32 %v1236_v38, 0.0  ;;  %v949_v54 = vpop.f32.mrb[34].mxu1  ;;  %v1229_v57 = vmax.f32 %v1227_v30, %v1228_v36  ;;  %v1245_v60 = vrot.slane %v1244_v31, 4  ;;  %v773_v43 = vpop.f32.mrb[34].mxu0  ;;  %v1062_v56 = vadd.f32 %v2773_v16, %v941_v5 }
 0x14c   : > { %v1462_v55 = vmax.f32 %v1222_v41, 0.0  ;;  %v951_v62 = vpop.f32.mrb[35].mxu1  ;;  %v1255_v63 = vmax.f32 %v1253_v39, %v1254_v48  ;;  %v1060_v2 = vadd.f32 %v2784_v21, %v763_v58  ;;  %v2910_v50 = vpop.f32.mrb[35].mxu0  ;;  %v1241_v3 = vmax.f32 %v1239_v42, %v1240_v59 }
 0x14d   : > { %v1512_v53 = vpack.c.bf16 %v1464_v47, %v1464_v47  ;;  %v1463_v61 = vmax.f32 %v1229_v57, 0.0  ;;  %v1246_v4 = vmax.f32 %v1244_v31, %v1245_v60  ;;  %v1272_v9 = vmax.f32 %v1059_v24, %v1062_v56 }
 0x14e   : > { %v1510_v6 = vpack.c.bf16 %v1462_v55, %v1462_v55  ;;  %v1256_v8 = vrot.slane %v1255_v63, 1  ;;  %v1258_v10 = vmax.f32 %v1057_v51, %v1060_v2  ;;  %v1242_v13 = vrot.slane %v1241_v3, 1 }
 0x14f   : > { %v1663_v7 = vunpack.c.l.b16 %v1512_v53  ;;  %v2912_v12 = vpack.c.bf16 %v1463_v61, %v1463_v61  ;;  %v1247_v17 = vrot.slane %v1246_v4, 2  ;;  %v1273_v58 = vrot.slane %v1272_v9, 4 }
 0x150   : > { %v1661_v11 = vunpack.c.l.b16 %v1510_v6  ;;  %v1257_v18 = vmax.f32 %v1255_v63, %v1256_v8  ;;  %v1259_v20 = vrot.slane %v1258_v10, 4  ;;  %v1243_v30 = vmax.f32 %v1241_v3, %v1242_v13 }
 0x151   : > { %v1719_v5 = vsel %vm1702_vm5, %v1663_v7, %v1718_v49  ;;  %v954_v27 = vpop.f32.mrb[36].mxu1  ;;  %v1248_v32 = vmax.f32 %v1246_v4, %v1247_v17  ;;  %v779_v33 = vpop.f32.mrb[36].mxu0  ;;  %v1274_v24 = vmax.f32 %v1272_v9, %v1273_v58  ;;  %v1061_v36 = vadd.f32 %v2794_v25, %v2897_v15 }
 0x152   : > { %v1703_v28 = vsel %vm1702_vm5, %v1661_v11, %v1701_v22  ;;  %v956_v38 = vpop.f32.mrb[37].mxu1  ;;  %v1467_v39 = vmax.f32 %v1257_v18, 0.0  ;;  %v1260_v41 = vmax.f32 %v1258_v10, %v1259_v20  ;;  %v781_v42 = vpop.f32.mrb[37].mxu0  ;;  %v1465_v31 = vmax.f32 %v1243_v30, 0.0 }
 0x153   : > { %v957_v49 = vpop.f32.mrb[38].mxu1  ;;  %v1249_v46 = vrot.slane %v1248_v32, 1  ;;  %v1065_v47 = vadd.f32 %v2768_v14, %v946_v40  ;;  %v1063_v22 = vadd.f32 %v2779_v19, %v769_v44  ;;  %v783_v48 = vpop.f32.mrb[38].mxu0  ;;  %v1275_v57 = vrot.slane %v1274_v24, 2 }
 0x154   : > { %v959_v51 = vpop.f32.mrb[39].mxu1  ;;  %v1515_v55 = vpack.c.bf16 %v1467_v39, %v1467_v39  ;;  %v1261_v59 = vrot.slane %v1260_v41, 2  ;;  %v1265_v60 = vmax.f32 %v1058_v52, %v1061_v36  ;;  %v2921_v62 = vpop.f32.mrb[39].mxu0  ;;  %v1513_v53 = vpack.c.bf16 %v1465_v31, %v1465_v31 }
 0x155   : > { %v1250_v63 = vmax.f32 %v1248_v32, %v1249_v46  ;;  %v1064_v15 = vadd.f32 %v2789_v23, %v771_v35  ;;  %v1068_v56 = vadd.f32 %v2773_v16, %v949_v54  ;;  %v1276_v6 = vmax.f32 %v1274_v24, %v1275_v57 }
 0x156   : > { %v1666_v2 = vunpack.c.l.b16 %v1515_v55  ;;  %v1262_v61 = vmax.f32 %v1260_v41, %v1261_v59  ;;  %v1266_v40 = vrot.slane %v1265_v60, 4  ;;  %v1664_v3 = vunpack.c.l.b16 %v1513_v53 }
 0x157   : > { %v1466_v44 = vmax.f32 %v1250_v63, 0.0  ;;  %v1293_v4 = vmax.f32 %v1065_v47, %v1068_v56  ;;  %v1066_v7 = vadd.f32 %v2784_v21, %v773_v43  ;;  %v1277_v52 = vrot.slane %v1276_v6, 1 }
 0x158   : > { %v2927_v8 = vsel %vm1704_vm6, %v1666_v2, %v1719_v5  ;;  %v1263_v9 = vrot.slane %v1262_v61, 1  ;;  %v1267_v10 = vmax.f32 %v1265_v60, %v1266_v40  ;;  %v2930_v35 = vsel %vm1704_vm6, %v1664_v3, %v1703_v28 }
 0x159   : > { %v962_v11 = vpop.f32.mrb[40].mxu1  ;;  %v2932_v54 = vpack.c.bf16 %v1466_v44, %v1466_v44  ;;  %v1294_v13 = vrot.slane %v1293_v4, 4  ;;  %v1279_v17 = vmax.f32 %v1063_v22, %v1066_v7  ;;  %v789_v18 = vpop.f32.mrb[40].mxu0  ;;  %v1278_v20 = vmax.f32 %v1276_v6, %v1277_v52 }
 0x15a   : > { %v964_v58 = vpop.f32.mrb[41].mxu1  ;;  %v1264_v30 = vmax.f32 %v1262_v61, %v1263_v9  ;;  %v1268_v32 = vrot.slane %v1267_v10, 2  ;;  %v1067_v43 = vadd.f32 %v2794_v25, %v2910_v50  ;;  %v791_v5 = vpop.f32.mrb[41].mxu0  ;;  %v1071_v28 = vadd.f32 %v2768_v14, %v954_v27 }
 0x15b   : > { %v965_v38 = vpop.f32.mrb[42].mxu1  ;;  %v1295_v24 = vmax.f32 %v1293_v4, %v1294_v13  ;;  %v1280_v41 = vrot.slane %v1279_v17, 4  ;;  %v793_v36 = vpop.f32.mrb[42].mxu0  ;;  %v1470_v46 = vmax.f32 %v1278_v20, 0.0  ;;  %v1069_v50 = vadd.f32 %v2779_v19, %v779_v33 }
 0x15c   : > { %v967_v31 = vpop.f32.mrb[43].mxu1  ;;  %v1468_v47 = vmax.f32 %v1264_v30, 0.0  ;;  %v1269_v22 = vmax.f32 %v1267_v10, %v1268_v32  ;;  %v1286_v51 = vmax.f32 %v1064_v15, %v1067_v43  ;;  %v2938_v55 = vpop.f32.mrb[43].mxu0  ;;  %v1070_v60 = vadd.f32 %v2789_v23, %v781_v42 }
 0x15d   : > { %v1296_v57 = vrot.slane %v1295_v24, 2  ;;  %v1281_v59 = vmax.f32 %v1279_v17, %v1280_v41  ;;  %v2942_v53 = vpack.c.bf16 %v1470_v46, %v1470_v46  ;;  %v1074_v61 = vadd.f32 %v2773_v16, %v957_v49 }
 0x15e   : > { %v2944_v63 = vpack.c.bf16 %v1468_v47, %v1468_v47  ;;  %v1270_v56 = vrot.slane %v1269_v22, 1  ;;  %v1287_v27 = vrot.slane %v1286_v51, 4  ;;  %v1072_v15 = vadd.f32 %v2784_v21, %v783_v48 }
 0x15f   : > { %v1297_v2 = vmax.f32 %v1295_v24, %v1296_v57  ;;  %v1282_v6 = vrot.slane %v1281_v59, 2  ;;  %v1669_v40 = vunpack.c.l.b16 %v2942_v53  ;;  %v1314_v52 = vmax.f32 %v1071_v28, %v1074_v61 }
 0x160   : > { %v1271_v44 = vmax.f32 %v1269_v22, %v1270_v56  ;;  %v1288_v33 = vmax.f32 %v1286_v51, %v1287_v27  ;;  %v1300_v9 = vmax.f32 %v1069_v50, %v1072_v15  ;;  %v1073_v49 = vadd.f32 %v2794_v25, %v2921_v62 }
 0x161   : > { %v2950_v4 = vpop.f32.mrb[44].mxu1  ;;  %v1298_v42 = vrot.slane %v1297_v2, 1  ;;  %v1283_v7 = vmax.f32 %v1281_v59, %v1282_v6  ;;  %v2952_v10 = vpop.f32.mrb[44].mxu0  ;;  %v1077_v48 = vadd.f32 %v2768_v14, %v962_v11  ;;  %v1315_v24 = vrot.slane %v1314_v52, 4 }
 0x162   : > { %v972_v13 = vpop.f32.mrb[45].mxu1  ;;  %v1469_v17 = vmax.f32 %v1271_v44, 0.0  ;;  %v1289_v58 = vrot.slane %v1288_v33, 2  ;;  %v2957_v20 = vpop.f32.mrb[45].mxu0  ;;  %v1301_v41 = vrot.slane %v1300_v9, 4  ;;  %v1307_v22 = vmax.f32 %v1070_v60, %v1073_v49 }
 0x163   : > { %v2959_v30 = vpop.f32.mrb[46].mxu1  ;;  %v1299_v32 = vmax.f32 %v1297_v2, %v1298_v42  ;;  %v1284_v43 = vrot.slane %v1283_v7, 1  ;;  %v2961_v28 = vpop.f32.mrb[46].mxu0  ;;  %v1075_v51 = vadd.f32 %v2779_v19, %v789_v18  ;;  %v1316_v57 = vmax.f32 %v1314_v52, %v1315_v24 }
 0x164   : > { %v975_v31 = vpop.f32.mrb[47].mxu1  ;;  %v2963_v46 = vpack.c.bf16 %v1469_v17, %v1469_v17  ;;  %v1290_v47 = vmax.f32 %v1288_v33, %v1289_v58  ;;  %v2966_v62 = vpop.f32.mrb[47].mxu0  ;;  %v1302_v59 = vmax.f32 %v1300_v9, %v1301_v41  ;;  %v1308_v56 = vrot.slane %v1307_v22, 4 }
 0x165   : > { %v1473_v14 = vmax.f32 %v1299_v32, 0.0  ;;  %v1285_v11 = vmax.f32 %v1283_v7, %v1284_v43  ;;  %v1076_v27 = vadd.f32 %v2789_v23, %v791_v5  ;;  %v1080_v2 = vadd.f32 %v2773_v16, %v965_v38 }
 0x166   : > { %v1291_v50 = vrot.slane %v1290_v47, 1  ;;  %v1317_v15 = vrot.slane %v1316_v57, 2  ;;  %v1303_v44 = vrot.slane %v1302_v59, 2  ;;  %v1309_v33 = vmax.f32 %v1307_v22, %v1308_v56 }
 0x167   : > { %v2970_v6 = vpack.c.bf16 %v1473_v14, %v1473_v14  ;;  %v1471_v61 = vmax.f32 %v1285_v11, 0.0  ;;  %v1335_v19 = vmax.f32 %v1077_v48, %v1080_v2  ;;  %v1078_v18 = vadd.f32 %v2784_v21, %v793_v36 }
 0x168   : > { %v1292_v60 = vmax.f32 %v1290_v47, %v1291_v50  ;;  %v1318_v9 = vmax.f32 %v1316_v57, %v1317_v15  ;;  %v1304_v23 = vmax.f32 %v1302_v59, %v1303_v44  ;;  %v1310_v13 = vrot.slane %v1309_v33, 2  ;;  %v2996_v50 = vld [vmem:[%s3235_s2 + $0x10] sm:$0xff] }
 0x169   : > { %v2973_v42 = vpop.f32.mrb[48].mxu1  ;;  %v1672_v7 = vunpack.c.l.b16 %v2970_v6  ;;  %v2976_v52 = vpack.c.bf16 %v1471_v61, %v1471_v61  ;;  %v2978_v5 = vpop.f32.mrb[48].mxu0  ;;  %v1336_v17 = vrot.slane %v1335_v19, 4  ;;  %v1321_v58 = vmax.f32 %v1075_v51, %v1078_v18 }
 0x16a   : > { %v980_v16 = vpop.f32.mrb[49].mxu1  ;;  %v1472_v38 = vmax.f32 %v1292_v60, 0.0  ;;  %v2980_v49 = vpop.f32.mrb[49].mxu0  ;;  %v1319_v36 = vrot.slane %v1318_v9, 1  ;;  %v1305_v32 = vrot.slane %v1304_v23, 1  ;;  %v1079_v43 = vadd.f32 %v2794_v25, %v2938_v55 }
 0x16b   : > { %v2982_v48 = vpop.f32.mrb[50].mxu1  ;;  %v1670_v21 = vunpack.c.l.b16 %v2976_v52  ;;  %v2987_v24 = vpop.f32.mrb[50].mxu0  ;;  %v1311_v47 = vmax.f32 %v1309_v33, %v1310_v13  ;;  %v1337_v22 = vmax.f32 %v1335_v19, %v1336_v17  ;;  %v1322_v14 = vrot.slane %v1321_v58, 4 }
 0x16c   : > { %v983_v41 = vpop.f32.mrb[51].mxu1  ;;  %v2989_v31 = vpack.c.bf16 %v1472_v38, %v1472_v38  ;;  %v2991_v51 = vpop.f32.mrb[51].mxu0  ;;  %v1320_v11 = vmax.f32 %v1318_v9, %v1319_v36  ;;  %v1306_v57 = vmax.f32 %v1304_v23, %v1305_v32  ;;  %v1328_v59 = vmax.f32 %v1076_v27, %v1079_v43  ;;  %v3004_v27 = vld [vmem:[%s3235_s2] sm:$0xff] }
 0x16d   : > { %v1083_v25 = vadd.f32 %v2996_v50, %v2950_v4  ;;  %v1312_v56 = vrot.slane %v1311_v47, 1  ;;  %v1338_v2 = vrot.slane %v1337_v22, 2  ;;  %v1323_v61 = vmax.f32 %v1321_v58, %v1322_v14  ;;  %v3011_v4 = vld [vmem:[%s3235_s2 + $0x8] sm:$0xff] }
 0x16e   : > { %v1671_v55 = vunpack.c.l.b16 %v2989_v31  ;;  %v1476_v15 = vmax.f32 %v1320_v11, 0.0  ;;  %v1474_v44 = vmax.f32 %v1306_v57, 0.0  ;;  %v1329_v60 = vrot.slane %v1328_v59, 4 }
 0x16f   : > { %v1081_v33 = vadd.f32 %v3004_v27, %v2952_v10  ;;  %v1313_v19 = vmax.f32 %v1311_v47, %v1312_v56  ;;  %v1339_v18 = vmax.f32 %v1337_v22, %v1338_v2  ;;  %v1324_v52 = vrot.slane %v1323_v61, 2  ;;  %v3020_v10 = vld [vmem:[%s3235_s2 + $0x28] sm:$0xff] }
 0x170   : > { %v1082_v9 = vadd.f32 %v3011_v4, %v2957_v20  ;;  %v1524_v16 = vpack.c.bf16 %v1476_v15, %v1476_v15  ;;  %v1522_v38 = vpack.c.bf16 %v1474_v44, %v1474_v44  ;;  %v1330_v13 = vmax.f32 %v1328_v59, %v1329_v60  ;;  %v3029_v20 = vld [vmem:[%s3235_s2 + $0x18] sm:$0xff] }
 0x171   : > { %v3015_v23 = vpop.f32.mrb[52].mxu1  ;;  %v1086_v17 = vadd.f32 %v3020_v10, %v2959_v30  ;;  %v3024_v58 = vpop.f32.mrb[52].mxu0  ;;  %v1475_v32 = vmax.f32 %v1313_v19, 0.0  ;;  %v1340_v43 = vrot.slane %v1339_v18, 1  ;;  %v1325_v41 = vmax.f32 %v1323_v61, %v1324_v52 }
 0x172   : > { %v988_v36 = vpop.f32.mrb[53].mxu1  ;;  %v1084_v31 = vadd.f32 %v3029_v20, %v2961_v28  ;;  %v3033_v47 = vpop.f32.mrb[53].mxu0  ;;  %v1675_v14 = vunpack.c.l.b16 %v1524_v16  ;;  %v1673_v30 = vunpack.c.l.b16 %v1522_v38  ;;  %v1331_v11 = vrot.slane %v1330_v13, 2 }
 0x173   : > { %v3035_v22 = vpop.f32.mrb[54].mxu1  ;;  %v1356_v57 = vmax.f32 %v1083_v25, %v1086_v17  ;;  %v3037_v59 = vpop.f32.mrb[54].mxu0  ;;  %v1523_v2 = vpack.c.bf16 %v1475_v32, %v1475_v32  ;;  %v1341_v61 = vmax.f32 %v1339_v18, %v1340_v43  ;;  %v1326_v15 = vrot.slane %v1325_v41, 1 }
 0x174   : > { %v991_v56 = vpop.f32.mrb[55].mxu1  ;;  %v1342_v44 = vmax.f32 %v1081_v33, %v1084_v31  ;;  %v3039_v60 = vpop.f32.mrb[55].mxu0  ;;  %v1736_v28 = vsel %vm1694_vm1, %v1675_v14, %v1672_v7  ;;  %v1722_v19 = vsel %vm1694_vm1, %v1673_v30, %v1670_v21  ;;  %v1332_v52 = vmax.f32 %v1330_v13, %v1331_v11  ;;  %v3048_v33 = vld [vmem:[%s3235_s2 + $0x20] sm:$0xff] }
 0x175   : > { %v1357_v16 = vrot.slane %v1356_v57, 4  ;;  %v1674_v38 = vunpack.c.l.b16 %v1523_v2  ;;  %v1479_v36 = vmax.f32 %v1341_v61, 0.0  ;;  %v1327_v25 = vmax.f32 %v1325_v41, %v1326_v15 }
 0x176   : > { %v1343_v17 = vrot.slane %v1342_v44, 4  ;;  %v1333_v3 = vrot.slane %v1332_v52, 1  ;;  %v1085_v6 = vadd.f32 %v3048_v33, %v2966_v62  ;;  %v1089_v7 = vadd.f32 %v2996_v50, %v2973_v42 }
 0x177   : > { %v1358_v56 = vmax.f32 %v1356_v57, %v1357_v16  ;;  %v1729_v21 = vsel %vm1694_vm1, %v1674_v38, %v1671_v55  ;;  %v1527_v18 = vpack.c.bf16 %v1479_v36, %v1479_v36  ;;  %v1477_v13 = vmax.f32 %v1327_v25, 0.0 }
 0x178   : > { %v1344_v32 = vmax.f32 %v1342_v44, %v1343_v17  ;;  %v1334_v41 = vmax.f32 %v1332_v52, %v1333_v3  ;;  %v1349_v14 = vmax.f32 %v1082_v9, %v1085_v6  ;;  %v1087_v30 = vadd.f32 %v3004_v27, %v2978_v5 }
 0x179   : > { %v3055_v43 = vpop.f32.mrb[56].mxu1  ;;  %v1359_v31 = vrot.slane %v1358_v56, 2  ;;  %v3059_v11 = vpop.f32.mrb[56].mxu0  ;;  %v1678_v62 = vunpack.c.l.b16 %v1527_v18  ;;  %v1525_v2 = vpack.c.bf16 %v1477_v13, %v1477_v13  ;;  %v1088_v42 = vadd.f32 %v3011_v4, %v2980_v49 }
 0x17a   : > { %v996_v57 = vpop.f32.mrb[57].mxu1  ;;  %v1345_v61 = vrot.slane %v1344_v32, 2  ;;  %v3063_v55 = vpop.f32.mrb[57].mxu0  ;;  %v1478_v44 = vmax.f32 %v1334_v41, 0.0  ;;  %v1350_v52 = vrot.slane %v1349_v14, 4  ;;  %v1092_v9 = vadd.f32 %v3020_v10, %v2982_v48 }
 0x17b   : > { %v3065_v15 = vpop.f32.mrb[58].mxu1  ;;  %v1360_v3 = vmax.f32 %v1358_v56, %v1359_v31  ;;  %v3069_v5 = vpop.f32.mrb[58].mxu0  ;;  %v1737_v38 = vsel %vm1696_vm2, %v1678_v62, %v1736_v28  ;;  %v1676_v36 = vunpack.c.l.b16 %v1525_v2  ;;  %v1090_v49 = vadd.f32 %v3029_v20, %v2987_v24 }
 0x17c   : > { %v999_v16 = vpop.f32.mrb[59].mxu1  ;;  %v1346_v25 = vmax.f32 %v1344_v32, %v1345_v61  ;;  %v3074_v17 = vpop.f32.mrb[59].mxu0  ;;  %v1526_v6 = vpack.c.bf16 %v1478_v44, %v1478_v44  ;;  %v1351_v13 = vmax.f32 %v1349_v14, %v1350_v52  ;;  %v1377_v56 = vmax.f32 %v1089_v7, %v1092_v9 }
 0x17d   : > { %v1361_v18 = vrot.slane %v1360_v3, 1  ;;  %v1723_v41 = vsel %vm1696_vm2, %v1676_v36, %v1722_v19  ;;  %v1363_v48 = vmax.f32 %v1087_v30, %v1090_v49  ;;  %v1091_v57 = vadd.f32 %v3048_v33, %v2991_v51 }
 0x17e   : > { %v1347_v31 = vrot.slane %v1346_v25, 1  ;;  %v1677_v16 = vunpack.c.l.b16 %v1526_v6  ;;  %v1352_v62 = vrot.slane %v1351_v13, 2  ;;  %v1378_v32 = vrot.slane %v1377_v56, 4 }
 0x17f   : > { %v1362_v28 = vmax.f32 %v1360_v3, %v1361_v18  ;;  %v1364_v61 = vrot.slane %v1363_v48, 4  ;;  %v1370_v24 = vmax.f32 %v1088_v42, %v1091_v57  ;;  %v1095_v44 = vadd.f32 %v2996_v50, %v3015_v23 }
 0x180   : > { %v1348_v2 = vmax.f32 %v1346_v25, %v1347_v31  ;;  %v3084_v7 = vsel %vm1696_vm2, %v1677_v16, %v1729_v21  ;;  %v1353_v14 = vmax.f32 %v1351_v13, %v1352_v62  ;;  %v1379_v30 = vmax.f32 %v1377_v56, %v1378_v32 }
 0x181   : > { %v3081_v39 = vpop.f32.mrb[60].mxu1  ;;  %v1482_v19 = vmax.f32 %v1362_v28, 0.0  ;;  %v3086_v52 = vpop.f32.mrb[60].mxu0  ;;  %v1365_v9 = vmax.f32 %v1363_v48, %v1364_v61  ;;  %v1371_v36 = vrot.slane %v1370_v24, 4  ;;  %v1093_v42 = vadd.f32 %v3004_v27, %v3024_v58 }
 0x182   : > { %v1004_v51 = vpop.f32.mrb[61].mxu1  ;;  %v1480_v3 = vmax.f32 %v1348_v2, 0.0  ;;  %v3090_v25 = vpop.f32.mrb[61].mxu0  ;;  %v1354_v6 = vrot.slane %v1353_v14, 1  ;;  %v1380_v21 = vrot.slane %v1379_v30, 2  ;;  %v1094_v18 = vadd.f32 %v3011_v4, %v3033_v47 }
 0x183   : > { %v3092_v23 = vpop.f32.mrb[62].mxu1  ;;  %v1530_v49 = vpack.c.bf16 %v1482_v19, %v1482_v19  ;;  %v3096_v13 = vpop.f32.mrb[62].mxu0  ;;  %v1366_v57 = vrot.slane %v1365_v9, 2  ;;  %v1372_v48 = vmax.f32 %v1370_v24, %v1371_v36  ;;  %v1098_v16 = vadd.f32 %v3020_v10, %v3035_v22 }
 0x184   : > { %v1007_v56 = vpop.f32.mrb[63].mxu1  ;;  %v1528_v31 = vpack.c.bf16 %v1480_v3, %v1480_v3  ;;  %v3100_v58 = vpop.f32.mrb[63].mxu0  ;;  %v1355_v62 = vmax.f32 %v1353_v14, %v1354_v6  ;;  %v1381_v32 = vmax.f32 %v1379_v30, %v1380_v21  ;;  %v1096_v2 = vadd.f32 %v3029_v20, %v3037_v59 }
 0x185   : > { %v1681_v28 = vunpack.c.l.b16 %v1530_v49  ;;  %v1367_v19 = vmax.f32 %v1365_v9, %v1366_v57  ;;  %v1373_v47 = vrot.slane %v1372_v48, 2  ;;  %v1398_v51 = vmax.f32 %v1095_v44, %v1098_v16 }
 0x186   : > { %v1679_v61 = vunpack.c.l.b16 %v1528_v31  ;;  %v1481_v3 = vmax.f32 %v1355_v62, 0.0  ;;  %v1382_v29 = vrot.slane %v1381_v32, 1  ;;  %v1384_v24 = vmax.f32 %v1093_v42, %v1096_v2 }
 0x187   : > { %v1738_v56 = vsel %vm1698_vm3, %v1681_v28, %v1737_v38  ;;  %v1368_v22 = vrot.slane %v1367_v19, 1  ;;  %v1374_v34 = vmax.f32 %v1372_v48, %v1373_v47  ;;  %v1399_v45 = vrot.slane %v1398_v51, 4 }
 0x188   : > { %v1724_v36 = vsel %vm1698_vm3, %v1679_v61, %v1723_v41  ;;  %v3106_v49 = vpack.c.bf16 %v1481_v3, %v1481_v3  ;;  %v1383_v14 = vmax.f32 %v1381_v32, %v1382_v29  ;;  %v1385_v30 = vrot.slane %v1384_v24, 4 }
 0x189   : > { %v1097_v59 = vadd.f32 %v3048_v33, %v3039_v60  ;;  %v1369_v9 = vmax.f32 %v1367_v19, %v1368_v22  ;;  %v1375_v6 = vrot.slane %v1374_v34, 1  ;;  %v1400_v44 = vmax.f32 %v1398_v51, %v1399_v45 }
 0x18a   : > { %v1101_v38 = vadd.f32 %v2996_v50, %v3055_v43  ;;  %v1680_v42 = vunpack.c.l.b16 %v3106_v49  ;;  %v1485_v21 = vmax.f32 %v1383_v14, 0.0  ;;  %v1386_v41 = vmax.f32 %v1384_v24, %v1385_v30 }
 0x18b   : > { %v1391_v31 = vmax.f32 %v1094_v18, %v1097_v59  ;;  %v1483_v57 = vmax.f32 %v1369_v9, 0.0  ;;  %v1376_v48 = vmax.f32 %v1374_v34, %v1375_v6  ;;  %v1401_v16 = vrot.slane %v1400_v44, 2 }
 0x18c   : > { %v1099_v29 = vadd.f32 %v3004_v27, %v3059_v11  ;;  %v1533_v28 = vpack.c.bf16 %v1485_v21, %v1485_v21  ;;  %v1387_v62 = vrot.slane %v1386_v41, 2  ;;  %v1100_v45 = vadd.f32 %v3011_v4, %v3063_v55 }
 0x18d   : > { %v1392_v60 = vrot.slane %v1391_v31, 4  ;;  %v1531_v32 = vpack.c.bf16 %v1483_v57, %v1483_v57  ;;  %v1484_v2 = vmax.f32 %v1376_v48, 0.0  ;;  %v1402_v43 = vmax.f32 %v1400_v44, %v1401_v16 }
 0x18e   : > { %v1104_v61 = vadd.f32 %v3020_v10, %v3065_v15  ;;  %v1684_v19 = vunpack.c.l.b16 %v1533_v28  ;;  %v1388_v18 = vmax.f32 %v1386_v41, %v1387_v62  ;;  %v1102_v34 = vadd.f32 %v3029_v20, %v3069_v5 }
 0x18f   : > { %v1393_v47 = vmax.f32 %v1391_v31, %v1392_v60  ;;  %v1682_v51 = vunpack.c.l.b16 %v1531_v32  ;;  %v3121_v11 = vpack.c.bf16 %v1484_v2, %v1484_v2  ;;  %v1403_v3 = vrot.slane %v1402_v43, 1 }
 0x190   : > { %v1419_v24 = vmax.f32 %v1101_v38, %v1104_v61  ;;  %v1739_v22 = vsel %vm1700_vm4, %v1684_v19, %v1738_v56  ;;  %v1389_v55 = vrot.slane %v1388_v18, 1  ;;  %v1405_v30 = vmax.f32 %v1099_v29, %v1102_v34 }
 0x191   : > { %v1394_v14 = vrot.slane %v1393_v47, 2  ;;  %v1725_v59 = vsel %vm1700_vm4, %v1682_v51, %v1724_v36  ;;  %v1683_v15 = vunpack.c.l.b16 %v3121_v11  ;;  %v1404_v9 = vmax.f32 %v1402_v43, %v1403_v3 }
 0x192   : > { %v1420_v6 = vrot.slane %v1419_v24, 4  ;;  %v1390_v44 = vmax.f32 %v1388_v18, %v1389_v55  ;;  %v1406_v41 = vrot.slane %v1405_v30, 4  ;;  %v1103_v5 = vadd.f32 %v3048_v33, %v3074_v17 }
 0x193   : > { %v1395_v21 = vmax.f32 %v1393_v47, %v1394_v14  ;;  %v1488_v31 = vmax.f32 %v1404_v9, 0.0  ;;  %v1107_v56 = vadd.f32 %v2996_v50, %v3081_v39  ;;  %v1105_v38 = vadd.f32 %v3004_v27, %v3086_v52 }
 0x194   : > { %v1421_v57 = vmax.f32 %v1419_v24, %v1420_v6  ;;  %v1486_v36 = vmax.f32 %v1390_v44, 0.0  ;;  %v1407_v16 = vmax.f32 %v1405_v30, %v1406_v41  ;;  %v1412_v29 = vmax.f32 %v1100_v45, %v1103_v5 }
 0x195   : > { %v1396_v48 = vrot.slane %v1395_v21, 1  ;;  %v1536_v28 = vpack.c.bf16 %v1488_v31, %v1488_v31  ;;  %v1106_v60 = vadd.f32 %v3011_v4, %v3090_v25  ;;  %v1110_v17 = vadd.f32 %v3020_v10, %v3092_v23 }
 0x196   : > { %v1422_v62 = vrot.slane %v1421_v57, 2  ;;  %v1534_v32 = vpack.c.bf16 %v1486_v36, %v1486_v36  ;;  %v1408_v43 = vrot.slane %v1407_v16, 2  ;;  %v1413_v39 = vrot.slane %v1412_v29, 4 }
 0x197   : > { %v1397_v2 = vmax.f32 %v1395_v21, %v1396_v48  ;;  %v1687_v50 = vunpack.c.l.b16 %v1536_v28  ;;  %v1440_v27 = vmax.f32 %v1107_v56, %v1110_v17  ;;  %v1108_v52 = vadd.f32 %v3029_v20, %v3096_v13 }
 0x198   : > { %v1423_v61 = vmax.f32 %v1421_v57, %v1422_v62  ;;  %v1685_v19 = vunpack.c.l.b16 %v1534_v32  ;;  %v1409_v18 = vmax.f32 %v1407_v16, %v1408_v43  ;;  %v1414_v47 = vmax.f32 %v1412_v29, %v1413_v39 }
 0x199   : > { %v1487_v45 = vmax.f32 %v1397_v2, 0.0  ;;  %v1740_v34 = vsel %vm1702_vm5, %v1687_v50, %v1739_v22  ;;  %v1441_v25 = vrot.slane %v1440_v27, 4  ;;  %v1426_v51 = vmax.f32 %v1105_v38, %v1108_v52 }
 0x19a   : > { %v1424_v4 = vrot.slane %v1423_v61, 1  ;;  %v1726_v10 = vsel %vm1702_vm5, %v1685_v19, %v1725_v59  ;;  %v1410_v3 = vrot.slane %v1409_v18, 1  ;;  %v1415_v24 = vrot.slane %v1414_v47, 2 }
 0x19b   : > { %v1535_v23 = vpack.c.bf16 %v1487_v45, %v1487_v45  ;;  %v1442_v14 = vmax.f32 %v1440_v27, %v1441_v25  ;;  %v1427_v30 = vrot.slane %v1426_v51, 4  ;;  %v1109_v20 = vadd.f32 %v3048_v33, %v3100_v58 }
 0x19c   : > { %v1425_v55 = vmax.f32 %v1423_v61, %v1424_v4  ;;  %v1411_v9 = vmax.f32 %v1409_v18, %v1410_v3  ;;  %v1416_v6 = vmax.f32 %v1414_v47, %v1415_v24  ;;  %v1721_v31 = vsel %vm1706_vm7, %v1669_v40, %v2927_v8 }
 0x19d   : > { %v1686_v13 = vunpack.c.l.b16 %v1535_v23  ;;  %v1443_v21 = vrot.slane %v1442_v14, 2  ;;  %v1428_v22 = vmax.f32 %v1426_v51, %v1427_v30  ;;  %v1433_v41 = vmax.f32 %v1106_v60, %v1109_v20 }
 0x19e   : > { %v1491_v44 = vmax.f32 %v1425_v55, 0.0  ;;  %v1489_v59 = vmax.f32 %v1411_v9, 0.0  ;;  %v1417_v5 = vrot.slane %v1416_v6, 1  ;;  %v1668_v57 = vunpack.c.l.b16 %v2963_v46 }
 0x19f   : > { %v1444_v58 = vmax.f32 %v1442_v14, %v1443_v21  ;;  %v1429_v56 = vrot.slane %v1428_v22, 2  ;;  %v1434_v38 = vrot.slane %v1433_v41, 4  ;;  %v3241_v16 = vunpack.c.l.b16 %v2888_v37 }
 0x1a0   : > { %v1539_v33 = vpack.c.bf16 %v1491_v44, %v1491_v44  ;;  %v1537_v36 = vpack.c.bf16 %v1489_v59, %v1489_v59  ;;  %v1418_v48 = vmax.f32 %v1416_v6, %v1417_v5  ;;  %v1731_v53 = vsel %vm1698_vm3, %v1680_v42, %v3084_v7 }
 0x1a1   : > { %v1710_v1 = vsel %vm1698_vm3, %v3241_v16, %v2880_v0  ;;  %v1445_v8 = vrot.slane %v1444_v58, 1  ;;  %v1430_v40 = vmax.f32 %v1428_v22, %v1429_v56  ;;  %v1435_v46 = vmax.f32 %v1433_v41, %v1434_v38  ;;  %v2155_v22 = vld [vmem:[%s3237_s4] ss:$0 sm:$0xff] }
 0x1a2   : > { %v1690_v29 = vunpack.c.l.b16 %v1539_v33  ;;  %v1688_v28 = vunpack.c.l.b16 %v1537_v36  ;;  %v1490_v62 = vmax.f32 %v1418_v48, 0.0  ;;  %v3242_v60 = vunpack.c.l.b16 %v2901_v26 }
 0x1a3   : > { %v1732_v37 = vsel %vm1700_vm4, %v1683_v15, %v1731_v53  ;;  %v1446_v32 = vmax.f32 %v1444_v58, %v1445_v8  ;;  %v1431_v49 = vrot.slane %v1430_v40, 1  ;;  %v1436_v2 = vrot.slane %v1435_v46, 2 }
 0x1a4   : > { %v1711_v17 = vsel %vm1700_vm4, %v3242_v60, %v1710_v1  ;;  %v1741_v0 = vsel %vm1704_vm6, %v1690_v29, %v1740_v34  ;;  %v1727_v7 = vsel %vm1704_vm6, %v1688_v28, %v1726_v10  ;;  %v1538_v42 = vpack.c.bf16 %v1490_v62, %v1490_v62 }
 0x1a5   : > { %v3243_v43 = vunpack.c.l.b16 %v2912_v12  ;;  %v1733_v26 = vsel %vm1702_vm5, %v1686_v13, %v1732_v37  ;;  %v1494_v50 = vmax.f32 %v1446_v32, 0.0  ;;  %v1432_v61 = vmax.f32 %v1430_v40, %v1431_v49 }
 0x1a6   : > { %v1437_v27 = vmax.f32 %v1435_v46, %v1436_v2  ;;  %v3244_v11 = vunpack.c.l.b16 %v2932_v54  ;;  %v1689_v52 = vunpack.c.l.b16 %v1538_v42  ;;  %v3245_v45 = vunpack.c.l.b16 %v2944_v63 }
 0x1a7   : > { %v1712_v39 = vsel %vm1702_vm5, %v3243_v43, %v1711_v17  ;;  %v1542_v12 = vpack.c.bf16 %v1494_v50, %v1494_v50  ;;  %v1492_v47 = vmax.f32 %v1432_v61, 0.0 }
 0x1a8   : > { %v1713_v15 = vsel %vm1704_vm6, %v3244_v11, %v1712_v39  ;;  %v1707_v18 = vsel %vm1706_vm7, %v3245_v45, %v2930_v35  ;;  %v1438_v34 = vrot.slane %v1437_v27, 1  ;;  %v1734_v4 = vsel %vm1704_vm6, %v1689_v52, %v1733_v26 }
 0x1a9   : > { %v1714_v19 = vsel %vm1706_vm7, %v1668_v57, %v1713_v15  ;;  %v1693_v25 = vunpack.c.l.b16 %v1542_v12  ;;  %v1540_v51 = vpack.c.bf16 %v1492_v47, %v1492_v47 }
 0x1aa   : > { %v1439_v10 = vmax.f32 %v1437_v27, %v1438_v34 }
 0x1ab   : > { %v1691_v23 = vunpack.c.l.b16 %v1540_v51  ;;  %v1742_v3 = vsel %vm1706_vm7, %v1693_v25, %v1741_v0 }
 0x1ac   : > { %v1493_v54 = vmax.f32 %v1439_v10, 0.0  ;;  %v1745_v24 = vpack.c.b16 %v1742_v3, %v1721_v31 }
 0x1ad   : > { %v1728_v14 = vsel %vm1706_vm7, %v1691_v23, %v1727_v7 }
 0x1ae   : > { %v1541_v55 = vpack.c.bf16 %v1493_v54, %v1493_v54  ;;  %2235 = vmatmul.mubr.bf16.vlgmr.msra.gmra.mrb[64].mxu1 %v1745_v24  ;;  %v1743_v63 = vpack.c.b16 %v1728_v14, %v1707_v18 }
 0x1b0   : > { %v1692_v35 = vunpack.c.l.b16 %v1541_v55 }
 0x1b2   : > { %v1735_v30 = vsel %vm1706_vm7, %v1692_v35, %v1734_v4 }
 0x1b3   : > { %v1744_v20 = vpack.c.b16 %v1735_v30, %v1714_v19 }
 0x1b5   : > { %1925 = vmatprep.mubr.bf16.mxu0 %v1744_v20 }
 0x1b6   : > { %1926 = vmatmul.mubr.bf16.vlgmr.msra.gmra.mrb[64].mxu0 %v1743_v63 }
 0x281   : > { %v1968_v13 = vpop.f32.mrb[64].mxu1 }
 0x282   : > { %v2236_v9 = vpop.f32.mrb[65].mxu1 }
 0x283   : > { %v1971_v6 = vpop.f32.mrb[66].mxu1 }
 0x284   : > { %v2237_v44 = vpop.f32.mrb[67].mxu1 }
 0x289   : > { %v2203_v21 = vpop.f32.mrb[64].mxu0 }
 0x28a   : > { %v2204_v41 = vpop.f32.mrb[65].mxu0 }
 0x28b   : > { %v2205_v59 = vadd.f32 %v2204_v41, %v2203_v21  ;;  %v2206_v5 = vpop.f32.mrb[66].mxu0 }
 0x28c   : > { %v2207_v31 = vpop.f32.mrb[67].mxu0 }
 0x28d   : > { %v1928_v57 = vadd.f32 %v2205_v59, %v2155_v22  ;;  %v2208_v33 = vadd.f32 %v2207_v31, %v2206_v5 }
 0x28f   : > { %v1969_v58 = vadd.f32 %v1968_v13, %v1928_v57  ;;  %v1931_v56 = vadd.f32 %v2208_v33, %v2155_v22 }
 0x291   : > { %1975 = vst [vmem:[%s220_s25] sm:$0xff] %v1969_v58  ;;  %v1972_v38 = vadd.f32 %v1971_v6, %v1931_v56 }
 0x293   : > { %1976 = vst [vmem:[%s220_s25 + $0x8] sm:$0xff] %v1972_v38 }
 0x294   : > { %2413 = shalt.err (!%p2410_p3)
}
 0x295   : > { %s2414_s30 = scalar_lea.hbm %s3190_s9, 256  ;;  %s2418_s16 = scalar_lea.hbm %s3238_s5, 512 }
 0x296   : > { %p2415_p4 = scmp.ne.s32.totalorder %s3190_s9, %s2414_s30  ;;  %p2419_p9 = scmp.lt.u32.totalorder %s3190_s9, %s3238_s5 }
 0x297   : > { %p2420_p10 = scmp.lt.u32.totalorder %s2418_s16, %s2414_s30  ;;  %p2422_p12 = scmp.lt.u32.totalorder %s2414_s30, %s3190_s9 }
 0x298   : > { %p2416_p7 = pnand %p2415_p4, %p2538_p5 }
 0x299   : > { %p2421_p11 = por %p2420_p10, %p2419_p9 }
 0x29a   : > { %p2417_p8 = pneg %p2416_p7 }
 0x29b   : > { %p2423_p13 = por %p2422_p12, %p2421_p11 }
 0x29d   : > { %p2424_p0 = pnand %p2423_p13, %p2417_p8 }
 0x29f   : > { %2427 = shalt.err (!%p2424_p0)
}
 0x2a0   : > { %s2468_s25 = smov 128   ;;  %s2469_s6 = smov 8  }
 0x2a1   : > { %2238 = dma.vmem_to_hbm [thread:$0]  (%p2538_p5), %s3185_s26, 256, %s3190_s9, %s3192_s10, %s2468_s25, %s2468_s25, %s2469_s6  }
 0x2a2 PF: > { %p2244_p1 = scmp.ge.s32.totalorder %s2462_s21, 2  ;;  %s2006_s7 = sand.u32 1, %s2450_s18  }
 0x2a3   : > { %s2007_s8 = scalar_lea.sflag [#allocation3], %s2006_s7 }
 0x2a4   : > { %p2241_p2 = pnand %p2244_p1, %p2542_p6 }
 0x2a6   : > { %2445 = dma.done.wait (!%p2241_p2), %s2007_s8, 256  }
 0x2a7   : > { %2447 = vsyncadd (!%p2241_p2), %s2007_s8, 4294967040  ;;  %p15_p3 = scmp.ge.s32.totalorder %s2525_s24, 4   ;;  %s3246_s18 = smov %s2454_s19 }
 0x2a8   : > { %s3247_s19 = smov %s2458_s20  ;;  %s3248_s20 = smov %s2536_s27 }
 0x2a9   : > { %s3249_s21 = smov %s2525_s24  ;;  %17 = sbr.rel (!%p15_p3) target bundleno = 3 (0x3), region = 75 }
 0x2b0   :  { %2012 = vsyncpa [#allocation3], 1 }
 0x2b1   :  { %2014 = vsyncpa [#allocation3 + $0x1], 1 }

</bundles_post_ra>
